<compile_context>
chip_gen: v7x
topology: tpu7x:2x2x1
jax: 0.10.0
libtpu: 0.0.40
codegen_flags: <defaults>
</compile_context>

<pallas_src>
import functools

import jax
import jax.numpy as jnp
from jax.experimental import pallas as pl
from jax.experimental.pallas import tpu as pltpu

_LANES = 128                 # vreg lane width (fast axis)
_DEFAULT_TILE_M = 4096       # (4096, 128) f32 block = 2 MiB -> 8 MiB double-buffered in+out
_MIN_PALLAS_BYTES = 1 << 16  # below 64 KiB, plain XLA elementwise is already optimal


def _product_kernel(x_ref, o_ref, *, a):
    """o = x * a for one (tile_m, 128) tile; `a` is a compile-time Python float."""
    o_ref[...] = x_ref[...] * a   # weak-typed scalar: stays in x's native dtype


def product_pallas(x, a, *, tile_m: int = _DEFAULT_TILE_M,
                   min_pallas_bytes: int = _MIN_PALLAS_BYTES):
    """Elementwise scalar multiply, HBM-roofline oriented.

    The array is flattened (free for contiguous layouts) into a lane-dense
    (rows, 128) slab in its native dtype and processed in large row tiles.
    Padding/slicing only happens when the flat size is not a multiple of 128.
    """
    a = float(a)
    orig_shape = x.shape
    n = x.size
    nbytes = n * x.dtype.itemsize

    # Tiny tensors: the fixed pallas_call + wrapper cost dwarfs the HBM traffic.
    if nbytes < min_pallas_bytes:
        return x * a

    flat = x.reshape(-1)                      # no dtype cast, no copy for contiguous x

    rem = n % _LANES
    if rem:
        # Rare path: pad only the sub-128 remainder so the slab is lane-dense.
        flat = jnp.pad(flat, (0, _LANES - rem))
    rows = flat.shape[0] // _LANES
    x2 = flat.reshape(rows, _LANES)

    # Block shape: full array when it fits in one tile (always legal), otherwise
    # a (tile_m, 128) block (tile_m % 8 == 0) with a ragged last grid step.
    tile = rows if rows <= tile_m else tile_m
    grid = pl.cdiv(rows, tile)

    out2 = pl.pallas_call(
        functools.partial(_product_kernel, a=a),
        out_shape=jax.ShapeDtypeStruct((rows, _LANES), x.dtype),
        grid=(grid,),
        in_specs=[pl.BlockSpec((tile, _LANES), lambda i: (i, 0))],
        out_specs=pl.BlockSpec((tile, _LANES), lambda i: (i, 0)),
        compiler_params=pltpu.CompilerParams(
            dimension_semantics=("parallel",),     # megacore sharding on v7x
            vmem_limit_bytes=32 << 20,             # safe on v5e/v6e/v7x, ample headroom
        ),
    )(x2)

    if rem:
        return out2.reshape(-1)[:n].reshape(orig_shape)
    return out2.reshape(orig_shape)


class ProductModule:
    """JAX/Pallas port of the PyTorch ProductModule: forward(x) = x * a."""

    def __init__(self, a: float):
        self.a = float(a)

    def __call__(self, x):
        return product_pallas(x, self.a)


if __name__ == "__main__":
    key = jax.random.PRNGKey(0)
    a_value = 2.5
    module = ProductModule(a_value)

    # Small, module-consistent input (hits the XLA fast path by design).
    x = jax.random.normal(key, (2, 4, 16, 16), jnp.float32)
    out = jax.block_until_ready(module(x))
    assert out.shape == x.shape, out.shape
    assert jnp.allclose(out, x * jnp.float32(a_value), atol=1e-6, rtol=1e-6)

    # Large input: exercises the Pallas kernel (multi-tile, no padding).
    key_big = jax.random.split(key, 2)[1]
    x_big = jax.random.normal(key_big, (2048, 512), jnp.float32)   # rows = 8192 -> 2 grid steps
    out_big = jax.block_until_ready(module(x_big))
    assert jnp.allclose(out_big, x_big * jnp.float32(a_value), atol=1e-6, rtol=1e-6)

    # Odd flat size forced through the Pallas kernel (pad/remainder path).
    x_odd = jax.random.normal(key, (3, 5, 7), jnp.float32)
    out_odd = jax.block_until_ready(product_pallas(x_odd, a_value, min_pallas_bytes=0))
    assert out_odd.shape == x_odd.shape
    assert jnp.allclose(out_odd, x_odd * jnp.float32(a_value), atol=1e-6, rtol=1e-6)

    # Non-f32 input: stays in native dtype end-to-end (no astype HBM passes).
    x_bf16 = jax.random.normal(key, (1024, 512), jnp.float32).astype(jnp.bfloat16)
    out_bf16 = jax.block_until_ready(module(x_bf16))
    assert out_bf16.dtype == jnp.bfloat16
    assert jnp.allclose(out_bf16.astype(jnp.float32),
                        (x_bf16 * a_value).astype(jnp.float32),
                        atol=1e-2, rtol=1e-2)

    print("KERNEL_OK")
</pallas_src>

<mosaic_0001>
module attributes {stable_mosaic.version = 11 : i64} {
  func.func @_product_kernel(%arg0: i32, %arg1: memref<4096x128xf32, #tpu.memory_space<vmem>>, %arg2: memref<4096x128xf32, #tpu.memory_space<vmem>>) attributes {dimension_semantics = [#tpu.dimension_semantics<parallel>], iteration_bounds = array<i64: 2>, scalar_prefetch = 0 : i64, scratch_operands = 0 : i64, tpu.core_type = #tpu.core_type<tc>, window_params = [{transform_indices = @transform_0, window_bounds = array<i64: 4096, 128>}, {transform_indices = @transform_1, window_bounds = array<i64: 4096, 128>}]} {
    %c0 = arith.constant 0 : index
    %c0_0 = arith.constant 0 : index
    %0 = vector.load %arg1[%c0, %c0_0] : memref<4096x128xf32, #tpu.memory_space<vmem>>, vector<4096x128xf32>
    %cst = arith.constant 2.500000e+00 : f32
    %1 = vector.broadcast %cst : f32 to vector<4096x128xf32>
    %2 = arith.mulf %0, %1 : vector<4096x128xf32>
    %c0_1 = arith.constant 0 : index
    %c0_2 = arith.constant 0 : index
    %3 = vector.load %arg2[%c0_1, %c0_2] : memref<4096x128xf32, #tpu.memory_space<vmem>>, vector<4096x128xf32>
    tpu.vector_store %arg2[%c0_1, %c0_2], %2 {strides = array<i32>} : memref<4096x128xf32, #tpu.memory_space<vmem>>, vector<4096x128xf32>,
    return
  }
  func.func @transform_0(%arg0: i32) -> (i32, i32) {
    %c0_i32 = arith.constant 0 : i32
    %c0_i32_0 = arith.constant 0 : i32
    return %arg0, %c0_i32 : i32, i32
  }
  func.func @transform_1(%arg0: i32) -> (i32, i32) {
    %c0_i32 = arith.constant 0 : i32
    %c0_i32_0 = arith.constant 0 : i32
    return %arg0, %c0_i32 : i32, i32
  }
}

</mosaic_0001>

<bundles_post_ra>
// kernel: tpu_custom_call.1
= control target key start
LH: loop header
LB: loop body
LE: loop exit
PB: predicated region body
PF: predicated region fallthrough
CT: control target
= control target key end

     0   :  { %6 = vsyncpa [#allocation3], 0  ;;  %s3131_s0 = inlined_call_operand.hbm [shape: f32[8192,128], index: 0, kind: input, shape index: {}]   ;;  %s3132_s1 = inlined_call_operand.hbm [shape: f32[8192,128], index: 1, kind: output, shape index: {}]  }
   0x1   :  { %8 = vsyncpa [#allocation3 + $0x1], 0 }
   0x2   :  { %9 = vsyncpa [#allocation4], 0 }
   0x3   :  { %11 = vsyncpa [#allocation4 + $0x1], 0  ;;  %s1940_s6 = smov 0   ;;  %s1942_s7 = smov 0  }
   0x4   :  { %s1944_s8 = smov 0   ;;  %s1946_s9 = smov 0  }
   0x5 LB: > { %s1961_s10 = sadd.s32 4294967295, %s1922_s9   ;;  %s1760_s11 = sadd.s32 4294967294, %s1922_s9   ;;  %s1922_s9 = sphi %s1946_s9, %s3145_s9   ;;  %s1918_s8 = sphi %s1944_s8, %s3144_s8   ;;  %s1914_s7 = sphi %s1942_s7, %s3143_s7   ;;  %s1910_s6 = sphi %s1940_s6, %s3142_s6  }
   0x6   : > { %s1965_s12 = sadd.s32 1, %s1922_s9   ;;  %s24_s13 = sadd.s32 1, %s1918_s8 }
   0x7   : > { %s21_s14 = ssub.s32 %s1922_s9, %s1965_s12  ;;  %p31_p0 = scmp.ne.s32.totalorder %s1918_s8, %s1914_s7 }
   0x8   : > { %p22_p1 = scmp.eq.s32.totalorder %s21_s14, 0  ;;  %p32_p2 = scmp.eq.s32.totalorder %s1922_s9, 0 }
   0x9   : > { %p37_p3 = scmp.ne.s32.totalorder %s1914_s7, %s1910_s6  ;;  %p38_p4 = scmp.eq.s32.totalorder %s1961_s10, 0 }
   0xa   : > { %s1977_s15 = scalar_select %p22_p1, %s1918_s8, %s24_s13  }
   0xb   : > { %p1979_p5 = por %p32_p2, %p31_p0  ;;  %p1983_p6 = por %p38_p4, %p37_p3 }
   0xc   : > { %p61_p7 = scmp.eq.s32.totalorder %s1961_s10, 1  ;;  %p67_p8 = scmp.eq.s32.totalorder %s1760_s11, 1 }
   0xd   : > { %p1788_p10 = scmp.lt.s32.totalorder %s1922_s9, 2  ;;  %s87_s20 = sand.u32 1, %s1918_s8  }
   0xe   : > { %p1990_p11 = por %p61_p7, %p31_p0  ;;  %p1994_p12 = por %p67_p8, %p37_p3 }
   0xf   : > { %s1774_s21 = sshll.u32 %s1922_s9, 16  ;;  %s1763_s22 = sshll.u32 %s87_s20, 12 }
  0x10   : > { %s3136_s18 = scalar_select %p1990_p11, 1, 0 }
  0x11   : > { %s3137_s19 = scalar_select %p1994_p12, 1, 0 }
  0x12   : > { %s2003_s25 = scalar_lea.hbm %s3131_s0, %s1774_s21  ;;  %s91_s26 = scalar_lea.vmem [#allocation2], %s1763_s22 }
  0x13   : > { %s98_s27 = sshll.u32 %s91_s26, 4  ;;  %p2007_p13 = pnand %p1788_p10, %p1979_p5  ;;  %s2011_s27 = int_to_ptr.vmem [resolvable:$true] %s98_s27 }
  0x14   : > { %s2013_s29 = scalar_lea.sflag [#allocation3], %s87_s20  ;;  %s1826_s30 = scalar_lea.hbm %s2003_s25, 65536 }
  0x15   : > { %p1827_p0 = scmp.ne.s32.totalorder %s2003_s25, %s1826_s30  ;;  %p1828_p1 = pneg %p2007_p13 }
  0x16   : > { %s1831_s4 = scalar_lea.hbm %s3131_s0, 131072  ;;  %p1832_p4 = scmp.lt.u32.totalorder %s2003_s25, %s3131_s0 }
  0x17   : > { %p1829_p2 = pnand %p1828_p1, %p1827_p0  ;;  %p1833_p5 = scmp.lt.u32.totalorder %s1831_s4, %s1826_s30 }
  0x18   : > { %p1835_p8 = scmp.lt.u32.totalorder %s1826_s30, %s2003_s25 }
  0x19   : > { %p1830_p3 = pneg %p1829_p2  ;;  %p1834_p7 = por %p1833_p5, %p1832_p4 }
  0x1b   : > { %p1836_p10 = por %p1835_p8, %p1834_p7 }
  0x1d   : > { %p1837_p9 = pnand %p1836_p10, %p1830_p3 }
  0x1f   : > { %1840 = shalt.err (!%p1837_p9)
}
  0x20   : > { %s1841_s13 = scalar_lea.vmem %s2011_s27, 65536  ;;  %s1924_s14 = smov [#allocation2]  }
  0x21   : > { %p1842_p0 = scmp.ne.s32.totalorder %s2011_s27, %s1841_s13  ;;  %s1846_s16 = sshll.u32 %s1924_s14, 4  ;;  %s1847_s16 = int_to_ptr.vmem [resolvable:$false] %s1846_s16 }
  0x22   : > { %s1848_s20 = scalar_lea.vmem %s1847_s16, 131072  ;;  %p1849_p11 = scmp.lt.s32.totalorder %s2011_s27, %s1847_s16 }
  0x23   : > { %p1844_p2 = pnand %p1842_p0, %p1828_p1  ;;  %p1850_p4 = scmp.lt.s32.totalorder %s1848_s20, %s1841_s13 }
  0x25   : > { %p1845_p12 = pneg %p1844_p2  ;;  %p1851_p5 = por %p1850_p4, %p1849_p11 }
  0x27   : > { %p1852_p7 = pnand %p1851_p5, %p1845_p12 }
  0x29   : > { %1855 = shalt.err (!%p1852_p7)
}
  0x2a   : > { %s1925_s21 = smov 128   ;;  %s1926_s22 = smov 8  }
  0x2b   : > { %1783 = dma.hbm_to_vmem [thread:$0]  (!%p2007_p13), %s2003_s25, 65536, %s2011_s27, %s2013_s29, %s1925_s21, %s1925_s21, %s1926_s22  }
  0x2c   : > { %p1766_p9 = scmp.ge.s32.totalorder %s1922_s9, 1  ;;  %p106_p1 = scmp.lt.s32.totalorder %s1922_s9, 3 }
  0x2e   : > { %p107_p3 = pnand %p1766_p9, %p106_p1 }
  0x2f   : > { %s2044_s23 = sand.u32 (!%p107_p3), 1, %s1914_s7  }
  0x30   : > { %110 = sbr.rel (%p107_p3) target bundleno = 336 (0x150), region = 24  ;;  %s1767_s24 = sshll.u32 (!%p107_p3), %s2044_s23, 12 }
  0x31   : > { %s113_s26 = scalar_lea.sflag (!%p107_p3), [#allocation3], %s2044_s23  ;;  %s2048_s30 = scalar_lea.vmem (!%p107_p3), [#allocation2], %s1767_s24 }
  0x37   : > { %1901 = dma.done.wait (%p1983_p6), %s113_s26, 65536  }
  0x38   : > { %1903 = vsyncadd (%p1983_p6), %s113_s26, 4294901760  ;;  %v137_v0 = vld [vmem:[%s2048_s30] sm:$0xff]  ;;  %v138_v1 = vld [vmem:[%s2048_s30 + $0x8] sm:$0xff]  ;;  %s2063_s17 = scalar_lea.vmem [#allocation5], %s1767_s24  ;;  %s1775_s25 = sshll.u32 %s1961_s10, 16 }
  0x39   : > { %v139_v2 = vld [vmem:[%s2048_s30 + $0x10] sm:$0xff]  ;;  %v649_v3 = vmul.f32 2.5, %v137_v0  ;;  %v650_v4 = vmul.f32 2.5, %v138_v1  ;;  %v140_v6 = vld [vmem:[%s2048_s30 + $0x18] sm:$0xff]  ;;  %v141_v7 = vld [vmem:[%s2048_s30 + $0x20] sm:$0xff]  ;;  %s1687_s27 = sshll.u32 %s2063_s17, 4  ;;  %s3083_s2 = scalar_lea.hbm %s3132_s1, %s1775_s25  ;;  %s3085_s27 = int_to_ptr.vmem [resolvable:$true] %s1687_s27 }
  0x3a   : > { %v651_v5 = vmul.f32 2.5, %v139_v2  ;;  %v142_v8 = vld [vmem:[%s2048_s30 + $0x28] sm:$0xff]  ;;  %v652_v9 = vmul.f32 2.5, %v140_v6  ;;  %v653_v10 = vmul.f32 2.5, %v141_v7  ;;  %v143_v12 = vld [vmem:[%s2048_s30 + $0x30] sm:$0xff]  ;;  %v144_v13 = vld [vmem:[%s2048_s30 + $0x38] sm:$0xff] }
  0x3b   : > { %v654_v11 = vmul.f32 2.5, %v142_v8  ;;  %v145_v14 = vld [vmem:[%s2048_s30 + $0x40] sm:$0xff]  ;;  %1161 = vst [vmem:[%s2063_s17] sm:$0xff] %v649_v3  ;;  %1162 = vst [vmem:[%s2063_s17 + $0x8] sm:$0xff] %v650_v4  ;;  %v655_v15 = vmul.f32 2.5, %v143_v12  ;;  %v656_v16 = vmul.f32 2.5, %v144_v13  ;;  %v146_v18 = vld [vmem:[%s2048_s30 + $0x48] sm:$0xff] }
  0x3c   : > { %1163 = vst [vmem:[%s2063_s17 + $0x10] sm:$0xff] %v651_v5  ;;  %v657_v17 = vmul.f32 2.5, %v145_v14  ;;  %v147_v19 = vld [vmem:[%s2048_s30 + $0x50] sm:$0xff]  ;;  %v148_v20 = vld [vmem:[%s2048_s30 + $0x58] sm:$0xff]  ;;  %1164 = vst [vmem:[%s2063_s17 + $0x18] sm:$0xff] %v652_v9  ;;  %v658_v21 = vmul.f32 2.5, %v146_v18 }
  0x3d   : > { %1165 = vst [vmem:[%s2063_s17 + $0x20] sm:$0xff] %v653_v10  ;;  %1166 = vst [vmem:[%s2063_s17 + $0x28] sm:$0xff] %v654_v11  ;;  %v659_v22 = vmul.f32 2.5, %v147_v19  ;;  %v660_v23 = vmul.f32 2.5, %v148_v20  ;;  %v149_v24 = vld [vmem:[%s2048_s30 + $0x60] sm:$0xff]  ;;  %v150_v25 = vld [vmem:[%s2048_s30 + $0x68] sm:$0xff] }
  0x3e   : > { %v151_v26 = vld [vmem:[%s2048_s30 + $0x70] sm:$0xff]  ;;  %1167 = vst [vmem:[%s2063_s17 + $0x30] sm:$0xff] %v655_v15  ;;  %1168 = vst [vmem:[%s2063_s17 + $0x38] sm:$0xff] %v656_v16  ;;  %v661_v27 = vmul.f32 2.5, %v149_v24  ;;  %v662_v28 = vmul.f32 2.5, %v150_v25  ;;  %v152_v30 = vld [vmem:[%s2048_s30 + $0x78] sm:$0xff] }
  0x3f   : > { %1169 = vst [vmem:[%s2063_s17 + $0x40] sm:$0xff] %v657_v17  ;;  %v663_v29 = vmul.f32 2.5, %v151_v26  ;;  %v153_v31 = vld [vmem:[%s2048_s30 + $0x80] sm:$0xff]  ;;  %v154_v32 = vld [vmem:[%s2048_s30 + $0x88] sm:$0xff]  ;;  %1170 = vst [vmem:[%s2063_s17 + $0x48] sm:$0xff] %v658_v21  ;;  %v664_v33 = vmul.f32 2.5, %v152_v30 }
  0x40   : > { %1171 = vst [vmem:[%s2063_s17 + $0x50] sm:$0xff] %v659_v22  ;;  %1172 = vst [vmem:[%s2063_s17 + $0x58] sm:$0xff] %v660_v23  ;;  %v665_v34 = vmul.f32 2.5, %v153_v31  ;;  %v666_v35 = vmul.f32 2.5, %v154_v32  ;;  %v155_v36 = vld [vmem:[%s2048_s30 + $0x90] sm:$0xff]  ;;  %v156_v37 = vld [vmem:[%s2048_s30 + $0x98] sm:$0xff] }
  0x41   : > { %v157_v38 = vld [vmem:[%s2048_s30 + $0xa0] sm:$0xff]  ;;  %1173 = vst [vmem:[%s2063_s17 + $0x60] sm:$0xff] %v661_v27  ;;  %1174 = vst [vmem:[%s2063_s17 + $0x68] sm:$0xff] %v662_v28  ;;  %v667_v39 = vmul.f32 2.5, %v155_v36  ;;  %v668_v40 = vmul.f32 2.5, %v156_v37  ;;  %v158_v42 = vld [vmem:[%s2048_s30 + $0xa8] sm:$0xff] }
  0x42   : > { %1175 = vst [vmem:[%s2063_s17 + $0x70] sm:$0xff] %v663_v29  ;;  %v669_v41 = vmul.f32 2.5, %v157_v38  ;;  %v159_v43 = vld [vmem:[%s2048_s30 + $0xb0] sm:$0xff]  ;;  %v160_v44 = vld [vmem:[%s2048_s30 + $0xb8] sm:$0xff]  ;;  %1176 = vst [vmem:[%s2063_s17 + $0x78] sm:$0xff] %v664_v33  ;;  %v670_v45 = vmul.f32 2.5, %v158_v42 }
  0x43   : > { %1177 = vst [vmem:[%s2063_s17 + $0x80] sm:$0xff] %v665_v34  ;;  %1178 = vst [vmem:[%s2063_s17 + $0x88] sm:$0xff] %v666_v35  ;;  %v671_v46 = vmul.f32 2.5, %v159_v43  ;;  %v672_v47 = vmul.f32 2.5, %v160_v44  ;;  %v161_v48 = vld [vmem:[%s2048_s30 + $0xc0] sm:$0xff]  ;;  %v162_v49 = vld [vmem:[%s2048_s30 + $0xc8] sm:$0xff] }
  0x44   : > { %v163_v50 = vld [vmem:[%s2048_s30 + $0xd0] sm:$0xff]  ;;  %1179 = vst [vmem:[%s2063_s17 + $0x90] sm:$0xff] %v667_v39  ;;  %1180 = vst [vmem:[%s2063_s17 + $0x98] sm:$0xff] %v668_v40  ;;  %v673_v51 = vmul.f32 2.5, %v161_v48  ;;  %v674_v52 = vmul.f32 2.5, %v162_v49  ;;  %v164_v54 = vld [vmem:[%s2048_s30 + $0xd8] sm:$0xff] }
  0x45   : > { %1181 = vst [vmem:[%s2063_s17 + $0xa0] sm:$0xff] %v669_v41  ;;  %v675_v53 = vmul.f32 2.5, %v163_v50  ;;  %v165_v55 = vld [vmem:[%s2048_s30 + $0xe0] sm:$0xff]  ;;  %v166_v56 = vld [vmem:[%s2048_s30 + $0xe8] sm:$0xff]  ;;  %1182 = vst [vmem:[%s2063_s17 + $0xa8] sm:$0xff] %v670_v45  ;;  %v676_v57 = vmul.f32 2.5, %v164_v54 }
  0x46   : > { %1183 = vst [vmem:[%s2063_s17 + $0xb0] sm:$0xff] %v671_v46  ;;  %1184 = vst [vmem:[%s2063_s17 + $0xb8] sm:$0xff] %v672_v47  ;;  %v677_v58 = vmul.f32 2.5, %v165_v55  ;;  %v678_v59 = vmul.f32 2.5, %v166_v56  ;;  %v167_v60 = vld [vmem:[%s2048_s30 + $0xf0] sm:$0xff]  ;;  %v168_v61 = vld [vmem:[%s2048_s30 + $0xf8] sm:$0xff] }
  0x47   : > { %v169_v62 = vld [vmem:[%s2048_s30 + $0x100] sm:$0xff]  ;;  %1185 = vst [vmem:[%s2063_s17 + $0xc0] sm:$0xff] %v673_v51  ;;  %1186 = vst [vmem:[%s2063_s17 + $0xc8] sm:$0xff] %v674_v52  ;;  %v679_v63 = vmul.f32 2.5, %v167_v60  ;;  %v680_v0 = vmul.f32 2.5, %v168_v61  ;;  %v170_v2 = vld [vmem:[%s2048_s30 + $0x108] sm:$0xff] }
  0x48   : > { %1187 = vst [vmem:[%s2063_s17 + $0xd0] sm:$0xff] %v675_v53  ;;  %v681_v1 = vmul.f32 2.5, %v169_v62  ;;  %v171_v3 = vld [vmem:[%s2048_s30 + $0x110] sm:$0xff]  ;;  %v172_v4 = vld [vmem:[%s2048_s30 + $0x118] sm:$0xff]  ;;  %1188 = vst [vmem:[%s2063_s17 + $0xd8] sm:$0xff] %v676_v57  ;;  %v682_v5 = vmul.f32 2.5, %v170_v2 }
  0x49   : > { %1189 = vst [vmem:[%s2063_s17 + $0xe0] sm:$0xff] %v677_v58  ;;  %1190 = vst [vmem:[%s2063_s17 + $0xe8] sm:$0xff] %v678_v59  ;;  %v683_v6 = vmul.f32 2.5, %v171_v3  ;;  %v684_v7 = vmul.f32 2.5, %v172_v4  ;;  %v173_v8 = vld [vmem:[%s2048_s30 + $0x120] sm:$0xff]  ;;  %v174_v9 = vld [vmem:[%s2048_s30 + $0x128] sm:$0xff] }
  0x4a   : > { %v175_v10 = vld [vmem:[%s2048_s30 + $0x130] sm:$0xff]  ;;  %1191 = vst [vmem:[%s2063_s17 + $0xf0] sm:$0xff] %v679_v63  ;;  %1192 = vst [vmem:[%s2063_s17 + $0xf8] sm:$0xff] %v680_v0  ;;  %v685_v11 = vmul.f32 2.5, %v173_v8  ;;  %v686_v12 = vmul.f32 2.5, %v174_v9  ;;  %v176_v14 = vld [vmem:[%s2048_s30 + $0x138] sm:$0xff] }
  0x4b   : > { %1193 = vst [vmem:[%s2063_s17 + $0x100] sm:$0xff] %v681_v1  ;;  %v687_v13 = vmul.f32 2.5, %v175_v10  ;;  %v177_v15 = vld [vmem:[%s2048_s30 + $0x140] sm:$0xff]  ;;  %v178_v16 = vld [vmem:[%s2048_s30 + $0x148] sm:$0xff]  ;;  %1194 = vst [vmem:[%s2063_s17 + $0x108] sm:$0xff] %v682_v5  ;;  %v688_v17 = vmul.f32 2.5, %v176_v14 }
  0x4c   : > { %1195 = vst [vmem:[%s2063_s17 + $0x110] sm:$0xff] %v683_v6  ;;  %1196 = vst [vmem:[%s2063_s17 + $0x118] sm:$0xff] %v684_v7  ;;  %v689_v18 = vmul.f32 2.5, %v177_v15  ;;  %v690_v19 = vmul.f32 2.5, %v178_v16  ;;  %v179_v20 = vld [vmem:[%s2048_s30 + $0x150] sm:$0xff]  ;;  %v180_v21 = vld [vmem:[%s2048_s30 + $0x158] sm:$0xff] }
  0x4d   : > { %v181_v22 = vld [vmem:[%s2048_s30 + $0x160] sm:$0xff]  ;;  %1197 = vst [vmem:[%s2063_s17 + $0x120] sm:$0xff] %v685_v11  ;;  %1198 = vst [vmem:[%s2063_s17 + $0x128] sm:$0xff] %v686_v12  ;;  %v691_v23 = vmul.f32 2.5, %v179_v20  ;;  %v692_v24 = vmul.f32 2.5, %v180_v21  ;;  %v182_v26 = vld [vmem:[%s2048_s30 + $0x168] sm:$0xff] }
  0x4e   : > { %1199 = vst [vmem:[%s2063_s17 + $0x130] sm:$0xff] %v687_v13  ;;  %v693_v25 = vmul.f32 2.5, %v181_v22  ;;  %v183_v27 = vld [vmem:[%s2048_s30 + $0x170] sm:$0xff]  ;;  %v184_v28 = vld [vmem:[%s2048_s30 + $0x178] sm:$0xff]  ;;  %1200 = vst [vmem:[%s2063_s17 + $0x138] sm:$0xff] %v688_v17  ;;  %v694_v29 = vmul.f32 2.5, %v182_v26 }
  0x4f   : > { %1201 = vst [vmem:[%s2063_s17 + $0x140] sm:$0xff] %v689_v18  ;;  %1202 = vst [vmem:[%s2063_s17 + $0x148] sm:$0xff] %v690_v19  ;;  %v695_v30 = vmul.f32 2.5, %v183_v27  ;;  %v696_v31 = vmul.f32 2.5, %v184_v28  ;;  %v185_v32 = vld [vmem:[%s2048_s30 + $0x180] sm:$0xff]  ;;  %v186_v33 = vld [vmem:[%s2048_s30 + $0x188] sm:$0xff] }
  0x50   : > { %v187_v34 = vld [vmem:[%s2048_s30 + $0x190] sm:$0xff]  ;;  %1203 = vst [vmem:[%s2063_s17 + $0x150] sm:$0xff] %v691_v23  ;;  %1204 = vst [vmem:[%s2063_s17 + $0x158] sm:$0xff] %v692_v24  ;;  %v697_v35 = vmul.f32 2.5, %v185_v32  ;;  %v698_v36 = vmul.f32 2.5, %v186_v33  ;;  %v188_v38 = vld [vmem:[%s2048_s30 + $0x198] sm:$0xff] }
  0x51   : > { %1205 = vst [vmem:[%s2063_s17 + $0x160] sm:$0xff] %v693_v25  ;;  %v699_v37 = vmul.f32 2.5, %v187_v34  ;;  %v189_v39 = vld [vmem:[%s2048_s30 + $0x1a0] sm:$0xff]  ;;  %v190_v40 = vld [vmem:[%s2048_s30 + $0x1a8] sm:$0xff]  ;;  %1206 = vst [vmem:[%s2063_s17 + $0x168] sm:$0xff] %v694_v29  ;;  %v700_v41 = vmul.f32 2.5, %v188_v38 }
  0x52   : > { %1207 = vst [vmem:[%s2063_s17 + $0x170] sm:$0xff] %v695_v30  ;;  %1208 = vst [vmem:[%s2063_s17 + $0x178] sm:$0xff] %v696_v31  ;;  %v701_v42 = vmul.f32 2.5, %v189_v39  ;;  %v702_v43 = vmul.f32 2.5, %v190_v40  ;;  %v191_v44 = vld [vmem:[%s2048_s30 + $0x1b0] sm:$0xff]  ;;  %v192_v45 = vld [vmem:[%s2048_s30 + $0x1b8] sm:$0xff] }
  0x53   : > { %v193_v46 = vld [vmem:[%s2048_s30 + $0x1c0] sm:$0xff]  ;;  %1209 = vst [vmem:[%s2063_s17 + $0x180] sm:$0xff] %v697_v35  ;;  %1210 = vst [vmem:[%s2063_s17 + $0x188] sm:$0xff] %v698_v36  ;;  %v703_v47 = vmul.f32 2.5, %v191_v44  ;;  %v704_v48 = vmul.f32 2.5, %v192_v45  ;;  %v194_v50 = vld [vmem:[%s2048_s30 + $0x1c8] sm:$0xff] }
  0x54   : > { %1211 = vst [vmem:[%s2063_s17 + $0x190] sm:$0xff] %v699_v37  ;;  %v705_v49 = vmul.f32 2.5, %v193_v46  ;;  %v195_v51 = vld [vmem:[%s2048_s30 + $0x1d0] sm:$0xff]  ;;  %v196_v52 = vld [vmem:[%s2048_s30 + $0x1d8] sm:$0xff]  ;;  %1212 = vst [vmem:[%s2063_s17 + $0x198] sm:$0xff] %v700_v41  ;;  %v706_v53 = vmul.f32 2.5, %v194_v50 }
  0x55   : > { %1213 = vst [vmem:[%s2063_s17 + $0x1a0] sm:$0xff] %v701_v42  ;;  %1214 = vst [vmem:[%s2063_s17 + $0x1a8] sm:$0xff] %v702_v43  ;;  %v707_v54 = vmul.f32 2.5, %v195_v51  ;;  %v708_v55 = vmul.f32 2.5, %v196_v52  ;;  %v197_v56 = vld [vmem:[%s2048_s30 + $0x1e0] sm:$0xff]  ;;  %v198_v57 = vld [vmem:[%s2048_s30 + $0x1e8] sm:$0xff] }
  0x56   : > { %v199_v58 = vld [vmem:[%s2048_s30 + $0x1f0] sm:$0xff]  ;;  %1215 = vst [vmem:[%s2063_s17 + $0x1b0] sm:$0xff] %v703_v47  ;;  %1216 = vst [vmem:[%s2063_s17 + $0x1b8] sm:$0xff] %v704_v48  ;;  %v709_v59 = vmul.f32 2.5, %v197_v56  ;;  %v710_v60 = vmul.f32 2.5, %v198_v57  ;;  %v200_v62 = vld [vmem:[%s2048_s30 + $0x1f8] sm:$0xff] }
  0x57   : > { %1217 = vst [vmem:[%s2063_s17 + $0x1c0] sm:$0xff] %v705_v49  ;;  %v711_v61 = vmul.f32 2.5, %v199_v58  ;;  %v201_v63 = vld [vmem:[%s2048_s30 + $0x200] sm:$0xff]  ;;  %v202_v0 = vld [vmem:[%s2048_s30 + $0x208] sm:$0xff]  ;;  %1218 = vst [vmem:[%s2063_s17 + $0x1c8] sm:$0xff] %v706_v53  ;;  %v712_v1 = vmul.f32 2.5, %v200_v62 }
  0x58   : > { %1219 = vst [vmem:[%s2063_s17 + $0x1d0] sm:$0xff] %v707_v54  ;;  %1220 = vst [vmem:[%s2063_s17 + $0x1d8] sm:$0xff] %v708_v55  ;;  %v713_v2 = vmul.f32 2.5, %v201_v63  ;;  %v714_v3 = vmul.f32 2.5, %v202_v0  ;;  %v203_v4 = vld [vmem:[%s2048_s30 + $0x210] sm:$0xff]  ;;  %v204_v5 = vld [vmem:[%s2048_s30 + $0x218] sm:$0xff] }
  0x59   : > { %v205_v6 = vld [vmem:[%s2048_s30 + $0x220] sm:$0xff]  ;;  %1221 = vst [vmem:[%s2063_s17 + $0x1e0] sm:$0xff] %v709_v59  ;;  %1222 = vst [vmem:[%s2063_s17 + $0x1e8] sm:$0xff] %v710_v60  ;;  %v715_v7 = vmul.f32 2.5, %v203_v4  ;;  %v716_v8 = vmul.f32 2.5, %v204_v5  ;;  %v206_v10 = vld [vmem:[%s2048_s30 + $0x228] sm:$0xff] }
  0x5a   : > { %1223 = vst [vmem:[%s2063_s17 + $0x1f0] sm:$0xff] %v711_v61  ;;  %v717_v9 = vmul.f32 2.5, %v205_v6  ;;  %v207_v11 = vld [vmem:[%s2048_s30 + $0x230] sm:$0xff]  ;;  %v208_v12 = vld [vmem:[%s2048_s30 + $0x238] sm:$0xff]  ;;  %1224 = vst [vmem:[%s2063_s17 + $0x1f8] sm:$0xff] %v712_v1  ;;  %v718_v13 = vmul.f32 2.5, %v206_v10 }
  0x5b   : > { %1225 = vst [vmem:[%s2063_s17 + $0x200] sm:$0xff] %v713_v2  ;;  %1226 = vst [vmem:[%s2063_s17 + $0x208] sm:$0xff] %v714_v3  ;;  %v719_v14 = vmul.f32 2.5, %v207_v11  ;;  %v720_v15 = vmul.f32 2.5, %v208_v12  ;;  %v209_v16 = vld [vmem:[%s2048_s30 + $0x240] sm:$0xff]  ;;  %v210_v17 = vld [vmem:[%s2048_s30 + $0x248] sm:$0xff] }
  0x5c   : > { %v211_v18 = vld [vmem:[%s2048_s30 + $0x250] sm:$0xff]  ;;  %1227 = vst [vmem:[%s2063_s17 + $0x210] sm:$0xff] %v715_v7  ;;  %1228 = vst [vmem:[%s2063_s17 + $0x218] sm:$0xff] %v716_v8  ;;  %v721_v19 = vmul.f32 2.5, %v209_v16  ;;  %v722_v20 = vmul.f32 2.5, %v210_v17  ;;  %v212_v22 = vld [vmem:[%s2048_s30 + $0x258] sm:$0xff] }
  0x5d   : > { %1229 = vst [vmem:[%s2063_s17 + $0x220] sm:$0xff] %v717_v9  ;;  %v723_v21 = vmul.f32 2.5, %v211_v18  ;;  %v213_v23 = vld [vmem:[%s2048_s30 + $0x260] sm:$0xff]  ;;  %v214_v24 = vld [vmem:[%s2048_s30 + $0x268] sm:$0xff]  ;;  %1230 = vst [vmem:[%s2063_s17 + $0x228] sm:$0xff] %v718_v13  ;;  %v724_v25 = vmul.f32 2.5, %v212_v22 }
  0x5e   : > { %1231 = vst [vmem:[%s2063_s17 + $0x230] sm:$0xff] %v719_v14  ;;  %1232 = vst [vmem:[%s2063_s17 + $0x238] sm:$0xff] %v720_v15  ;;  %v725_v26 = vmul.f32 2.5, %v213_v23  ;;  %v726_v27 = vmul.f32 2.5, %v214_v24  ;;  %v215_v28 = vld [vmem:[%s2048_s30 + $0x270] sm:$0xff]  ;;  %v216_v29 = vld [vmem:[%s2048_s30 + $0x278] sm:$0xff] }
  0x5f   : > { %v217_v30 = vld [vmem:[%s2048_s30 + $0x280] sm:$0xff]  ;;  %1233 = vst [vmem:[%s2063_s17 + $0x240] sm:$0xff] %v721_v19  ;;  %1234 = vst [vmem:[%s2063_s17 + $0x248] sm:$0xff] %v722_v20  ;;  %v727_v31 = vmul.f32 2.5, %v215_v28  ;;  %v728_v32 = vmul.f32 2.5, %v216_v29  ;;  %v218_v34 = vld [vmem:[%s2048_s30 + $0x288] sm:$0xff] }
  0x60   : > { %1235 = vst [vmem:[%s2063_s17 + $0x250] sm:$0xff] %v723_v21  ;;  %v729_v33 = vmul.f32 2.5, %v217_v30  ;;  %v219_v35 = vld [vmem:[%s2048_s30 + $0x290] sm:$0xff]  ;;  %v220_v36 = vld [vmem:[%s2048_s30 + $0x298] sm:$0xff]  ;;  %1236 = vst [vmem:[%s2063_s17 + $0x258] sm:$0xff] %v724_v25  ;;  %v730_v37 = vmul.f32 2.5, %v218_v34 }
  0x61   : > { %1237 = vst [vmem:[%s2063_s17 + $0x260] sm:$0xff] %v725_v26  ;;  %1238 = vst [vmem:[%s2063_s17 + $0x268] sm:$0xff] %v726_v27  ;;  %v731_v38 = vmul.f32 2.5, %v219_v35  ;;  %v732_v39 = vmul.f32 2.5, %v220_v36  ;;  %v221_v40 = vld [vmem:[%s2048_s30 + $0x2a0] sm:$0xff]  ;;  %v222_v41 = vld [vmem:[%s2048_s30 + $0x2a8] sm:$0xff] }
  0x62   : > { %v223_v42 = vld [vmem:[%s2048_s30 + $0x2b0] sm:$0xff]  ;;  %1239 = vst [vmem:[%s2063_s17 + $0x270] sm:$0xff] %v727_v31  ;;  %1240 = vst [vmem:[%s2063_s17 + $0x278] sm:$0xff] %v728_v32  ;;  %v733_v43 = vmul.f32 2.5, %v221_v40  ;;  %v734_v44 = vmul.f32 2.5, %v222_v41  ;;  %v224_v46 = vld [vmem:[%s2048_s30 + $0x2b8] sm:$0xff] }
  0x63   : > { %1241 = vst [vmem:[%s2063_s17 + $0x280] sm:$0xff] %v729_v33  ;;  %v735_v45 = vmul.f32 2.5, %v223_v42  ;;  %v225_v47 = vld [vmem:[%s2048_s30 + $0x2c0] sm:$0xff]  ;;  %v226_v48 = vld [vmem:[%s2048_s30 + $0x2c8] sm:$0xff]  ;;  %1242 = vst [vmem:[%s2063_s17 + $0x288] sm:$0xff] %v730_v37  ;;  %v736_v49 = vmul.f32 2.5, %v224_v46 }
  0x64   : > { %1243 = vst [vmem:[%s2063_s17 + $0x290] sm:$0xff] %v731_v38  ;;  %1244 = vst [vmem:[%s2063_s17 + $0x298] sm:$0xff] %v732_v39  ;;  %v737_v50 = vmul.f32 2.5, %v225_v47  ;;  %v738_v51 = vmul.f32 2.5, %v226_v48  ;;  %v227_v52 = vld [vmem:[%s2048_s30 + $0x2d0] sm:$0xff]  ;;  %v228_v53 = vld [vmem:[%s2048_s30 + $0x2d8] sm:$0xff] }
  0x65   : > { %v229_v54 = vld [vmem:[%s2048_s30 + $0x2e0] sm:$0xff]  ;;  %1245 = vst [vmem:[%s2063_s17 + $0x2a0] sm:$0xff] %v733_v43  ;;  %1246 = vst [vmem:[%s2063_s17 + $0x2a8] sm:$0xff] %v734_v44  ;;  %v739_v55 = vmul.f32 2.5, %v227_v52  ;;  %v740_v56 = vmul.f32 2.5, %v228_v53  ;;  %v230_v58 = vld [vmem:[%s2048_s30 + $0x2e8] sm:$0xff] }
  0x66   : > { %1247 = vst [vmem:[%s2063_s17 + $0x2b0] sm:$0xff] %v735_v45  ;;  %v741_v57 = vmul.f32 2.5, %v229_v54  ;;  %v231_v59 = vld [vmem:[%s2048_s30 + $0x2f0] sm:$0xff]  ;;  %v232_v60 = vld [vmem:[%s2048_s30 + $0x2f8] sm:$0xff]  ;;  %1248 = vst [vmem:[%s2063_s17 + $0x2b8] sm:$0xff] %v736_v49  ;;  %v742_v61 = vmul.f32 2.5, %v230_v58 }
  0x67   : > { %1249 = vst [vmem:[%s2063_s17 + $0x2c0] sm:$0xff] %v737_v50  ;;  %1250 = vst [vmem:[%s2063_s17 + $0x2c8] sm:$0xff] %v738_v51  ;;  %v743_v62 = vmul.f32 2.5, %v231_v59  ;;  %v744_v63 = vmul.f32 2.5, %v232_v60  ;;  %v233_v0 = vld [vmem:[%s2048_s30 + $0x300] sm:$0xff]  ;;  %v234_v1 = vld [vmem:[%s2048_s30 + $0x308] sm:$0xff] }
  0x68   : > { %v235_v2 = vld [vmem:[%s2048_s30 + $0x310] sm:$0xff]  ;;  %1251 = vst [vmem:[%s2063_s17 + $0x2d0] sm:$0xff] %v739_v55  ;;  %1252 = vst [vmem:[%s2063_s17 + $0x2d8] sm:$0xff] %v740_v56  ;;  %v745_v3 = vmul.f32 2.5, %v233_v0  ;;  %v746_v4 = vmul.f32 2.5, %v234_v1  ;;  %v236_v6 = vld [vmem:[%s2048_s30 + $0x318] sm:$0xff] }
  0x69   : > { %1253 = vst [vmem:[%s2063_s17 + $0x2e0] sm:$0xff] %v741_v57  ;;  %v747_v5 = vmul.f32 2.5, %v235_v2  ;;  %v237_v7 = vld [vmem:[%s2048_s30 + $0x320] sm:$0xff]  ;;  %v238_v8 = vld [vmem:[%s2048_s30 + $0x328] sm:$0xff]  ;;  %1254 = vst [vmem:[%s2063_s17 + $0x2e8] sm:$0xff] %v742_v61  ;;  %v748_v9 = vmul.f32 2.5, %v236_v6 }
  0x6a   : > { %1255 = vst [vmem:[%s2063_s17 + $0x2f0] sm:$0xff] %v743_v62  ;;  %1256 = vst [vmem:[%s2063_s17 + $0x2f8] sm:$0xff] %v744_v63  ;;  %v749_v10 = vmul.f32 2.5, %v237_v7  ;;  %v750_v11 = vmul.f32 2.5, %v238_v8  ;;  %v239_v12 = vld [vmem:[%s2048_s30 + $0x330] sm:$0xff]  ;;  %v240_v13 = vld [vmem:[%s2048_s30 + $0x338] sm:$0xff] }
  0x6b   : > { %v241_v14 = vld [vmem:[%s2048_s30 + $0x340] sm:$0xff]  ;;  %1257 = vst [vmem:[%s2063_s17 + $0x300] sm:$0xff] %v745_v3  ;;  %1258 = vst [vmem:[%s2063_s17 + $0x308] sm:$0xff] %v746_v4  ;;  %v751_v15 = vmul.f32 2.5, %v239_v12  ;;  %v752_v16 = vmul.f32 2.5, %v240_v13  ;;  %v242_v18 = vld [vmem:[%s2048_s30 + $0x348] sm:$0xff] }
  0x6c   : > { %1259 = vst [vmem:[%s2063_s17 + $0x310] sm:$0xff] %v747_v5  ;;  %v753_v17 = vmul.f32 2.5, %v241_v14  ;;  %v243_v19 = vld [vmem:[%s2048_s30 + $0x350] sm:$0xff]  ;;  %v244_v20 = vld [vmem:[%s2048_s30 + $0x358] sm:$0xff]  ;;  %1260 = vst [vmem:[%s2063_s17 + $0x318] sm:$0xff] %v748_v9  ;;  %v754_v21 = vmul.f32 2.5, %v242_v18 }
  0x6d   : > { %1261 = vst [vmem:[%s2063_s17 + $0x320] sm:$0xff] %v749_v10  ;;  %1262 = vst [vmem:[%s2063_s17 + $0x328] sm:$0xff] %v750_v11  ;;  %v755_v22 = vmul.f32 2.5, %v243_v19  ;;  %v756_v23 = vmul.f32 2.5, %v244_v20  ;;  %v245_v24 = vld [vmem:[%s2048_s30 + $0x360] sm:$0xff]  ;;  %v246_v25 = vld [vmem:[%s2048_s30 + $0x368] sm:$0xff] }
  0x6e   : > { %v247_v26 = vld [vmem:[%s2048_s30 + $0x370] sm:$0xff]  ;;  %1263 = vst [vmem:[%s2063_s17 + $0x330] sm:$0xff] %v751_v15  ;;  %1264 = vst [vmem:[%s2063_s17 + $0x338] sm:$0xff] %v752_v16  ;;  %v757_v27 = vmul.f32 2.5, %v245_v24  ;;  %v758_v28 = vmul.f32 2.5, %v246_v25  ;;  %v248_v30 = vld [vmem:[%s2048_s30 + $0x378] sm:$0xff] }
  0x6f   : > { %1265 = vst [vmem:[%s2063_s17 + $0x340] sm:$0xff] %v753_v17  ;;  %v759_v29 = vmul.f32 2.5, %v247_v26  ;;  %v249_v31 = vld [vmem:[%s2048_s30 + $0x380] sm:$0xff]  ;;  %v250_v32 = vld [vmem:[%s2048_s30 + $0x388] sm:$0xff]  ;;  %1266 = vst [vmem:[%s2063_s17 + $0x348] sm:$0xff] %v754_v21  ;;  %v760_v33 = vmul.f32 2.5, %v248_v30 }
  0x70   : > { %1267 = vst [vmem:[%s2063_s17 + $0x350] sm:$0xff] %v755_v22  ;;  %1268 = vst [vmem:[%s2063_s17 + $0x358] sm:$0xff] %v756_v23  ;;  %v761_v34 = vmul.f32 2.5, %v249_v31  ;;  %v762_v35 = vmul.f32 2.5, %v250_v32  ;;  %v251_v36 = vld [vmem:[%s2048_s30 + $0x390] sm:$0xff]  ;;  %v252_v37 = vld [vmem:[%s2048_s30 + $0x398] sm:$0xff] }
  0x71   : > { %v253_v38 = vld [vmem:[%s2048_s30 + $0x3a0] sm:$0xff]  ;;  %1269 = vst [vmem:[%s2063_s17 + $0x360] sm:$0xff] %v757_v27  ;;  %1270 = vst [vmem:[%s2063_s17 + $0x368] sm:$0xff] %v758_v28  ;;  %v763_v39 = vmul.f32 2.5, %v251_v36  ;;  %v764_v40 = vmul.f32 2.5, %v252_v37  ;;  %v254_v42 = vld [vmem:[%s2048_s30 + $0x3a8] sm:$0xff] }
  0x72   : > { %1271 = vst [vmem:[%s2063_s17 + $0x370] sm:$0xff] %v759_v29  ;;  %v765_v41 = vmul.f32 2.5, %v253_v38  ;;  %v255_v43 = vld [vmem:[%s2048_s30 + $0x3b0] sm:$0xff]  ;;  %v256_v44 = vld [vmem:[%s2048_s30 + $0x3b8] sm:$0xff]  ;;  %1272 = vst [vmem:[%s2063_s17 + $0x378] sm:$0xff] %v760_v33  ;;  %v766_v45 = vmul.f32 2.5, %v254_v42 }
  0x73   : > { %1273 = vst [vmem:[%s2063_s17 + $0x380] sm:$0xff] %v761_v34  ;;  %1274 = vst [vmem:[%s2063_s17 + $0x388] sm:$0xff] %v762_v35  ;;  %v767_v46 = vmul.f32 2.5, %v255_v43  ;;  %v768_v47 = vmul.f32 2.5, %v256_v44  ;;  %v257_v48 = vld [vmem:[%s2048_s30 + $0x3c0] sm:$0xff]  ;;  %v258_v49 = vld [vmem:[%s2048_s30 + $0x3c8] sm:$0xff] }
  0x74   : > { %v259_v50 = vld [vmem:[%s2048_s30 + $0x3d0] sm:$0xff]  ;;  %1275 = vst [vmem:[%s2063_s17 + $0x390] sm:$0xff] %v763_v39  ;;  %1276 = vst [vmem:[%s2063_s17 + $0x398] sm:$0xff] %v764_v40  ;;  %v769_v51 = vmul.f32 2.5, %v257_v48  ;;  %v770_v52 = vmul.f32 2.5, %v258_v49  ;;  %v260_v54 = vld [vmem:[%s2048_s30 + $0x3d8] sm:$0xff] }
  0x75   : > { %1277 = vst [vmem:[%s2063_s17 + $0x3a0] sm:$0xff] %v765_v41  ;;  %v771_v53 = vmul.f32 2.5, %v259_v50  ;;  %v261_v55 = vld [vmem:[%s2048_s30 + $0x3e0] sm:$0xff]  ;;  %v262_v56 = vld [vmem:[%s2048_s30 + $0x3e8] sm:$0xff]  ;;  %1278 = vst [vmem:[%s2063_s17 + $0x3a8] sm:$0xff] %v766_v45  ;;  %v772_v57 = vmul.f32 2.5, %v260_v54 }
  0x76   : > { %1279 = vst [vmem:[%s2063_s17 + $0x3b0] sm:$0xff] %v767_v46  ;;  %1280 = vst [vmem:[%s2063_s17 + $0x3b8] sm:$0xff] %v768_v47  ;;  %v773_v58 = vmul.f32 2.5, %v261_v55  ;;  %v774_v59 = vmul.f32 2.5, %v262_v56  ;;  %v263_v60 = vld [vmem:[%s2048_s30 + $0x3f0] sm:$0xff]  ;;  %v264_v61 = vld [vmem:[%s2048_s30 + $0x3f8] sm:$0xff] }
  0x77   : > { %v265_v62 = vld [vmem:[%s2048_s30 + $0x400] sm:$0xff]  ;;  %1281 = vst [vmem:[%s2063_s17 + $0x3c0] sm:$0xff] %v769_v51  ;;  %1282 = vst [vmem:[%s2063_s17 + $0x3c8] sm:$0xff] %v770_v52  ;;  %v775_v63 = vmul.f32 2.5, %v263_v60  ;;  %v776_v0 = vmul.f32 2.5, %v264_v61  ;;  %v266_v2 = vld [vmem:[%s2048_s30 + $0x408] sm:$0xff] }
  0x78   : > { %1283 = vst [vmem:[%s2063_s17 + $0x3d0] sm:$0xff] %v771_v53  ;;  %v777_v1 = vmul.f32 2.5, %v265_v62  ;;  %v267_v3 = vld [vmem:[%s2048_s30 + $0x410] sm:$0xff]  ;;  %v268_v4 = vld [vmem:[%s2048_s30 + $0x418] sm:$0xff]  ;;  %1284 = vst [vmem:[%s2063_s17 + $0x3d8] sm:$0xff] %v772_v57  ;;  %v778_v5 = vmul.f32 2.5, %v266_v2 }
  0x79   : > { %1285 = vst [vmem:[%s2063_s17 + $0x3e0] sm:$0xff] %v773_v58  ;;  %1286 = vst [vmem:[%s2063_s17 + $0x3e8] sm:$0xff] %v774_v59  ;;  %v779_v6 = vmul.f32 2.5, %v267_v3  ;;  %v780_v7 = vmul.f32 2.5, %v268_v4  ;;  %v269_v8 = vld [vmem:[%s2048_s30 + $0x420] sm:$0xff]  ;;  %v270_v9 = vld [vmem:[%s2048_s30 + $0x428] sm:$0xff] }
  0x7a   : > { %v271_v10 = vld [vmem:[%s2048_s30 + $0x430] sm:$0xff]  ;;  %1287 = vst [vmem:[%s2063_s17 + $0x3f0] sm:$0xff] %v775_v63  ;;  %1288 = vst [vmem:[%s2063_s17 + $0x3f8] sm:$0xff] %v776_v0  ;;  %v781_v11 = vmul.f32 2.5, %v269_v8  ;;  %v782_v12 = vmul.f32 2.5, %v270_v9  ;;  %v272_v14 = vld [vmem:[%s2048_s30 + $0x438] sm:$0xff] }
  0x7b   : > { %1289 = vst [vmem:[%s2063_s17 + $0x400] sm:$0xff] %v777_v1  ;;  %v783_v13 = vmul.f32 2.5, %v271_v10  ;;  %v273_v15 = vld [vmem:[%s2048_s30 + $0x440] sm:$0xff]  ;;  %v274_v16 = vld [vmem:[%s2048_s30 + $0x448] sm:$0xff]  ;;  %1290 = vst [vmem:[%s2063_s17 + $0x408] sm:$0xff] %v778_v5  ;;  %v784_v17 = vmul.f32 2.5, %v272_v14 }
  0x7c   : > { %1291 = vst [vmem:[%s2063_s17 + $0x410] sm:$0xff] %v779_v6  ;;  %1292 = vst [vmem:[%s2063_s17 + $0x418] sm:$0xff] %v780_v7  ;;  %v785_v18 = vmul.f32 2.5, %v273_v15  ;;  %v786_v19 = vmul.f32 2.5, %v274_v16  ;;  %v275_v20 = vld [vmem:[%s2048_s30 + $0x450] sm:$0xff]  ;;  %v276_v21 = vld [vmem:[%s2048_s30 + $0x458] sm:$0xff] }
  0x7d   : > { %v277_v22 = vld [vmem:[%s2048_s30 + $0x460] sm:$0xff]  ;;  %1293 = vst [vmem:[%s2063_s17 + $0x420] sm:$0xff] %v781_v11  ;;  %1294 = vst [vmem:[%s2063_s17 + $0x428] sm:$0xff] %v782_v12  ;;  %v787_v23 = vmul.f32 2.5, %v275_v20  ;;  %v788_v24 = vmul.f32 2.5, %v276_v21  ;;  %v278_v26 = vld [vmem:[%s2048_s30 + $0x468] sm:$0xff] }
  0x7e   : > { %1295 = vst [vmem:[%s2063_s17 + $0x430] sm:$0xff] %v783_v13  ;;  %v789_v25 = vmul.f32 2.5, %v277_v22  ;;  %v279_v27 = vld [vmem:[%s2048_s30 + $0x470] sm:$0xff]  ;;  %v280_v28 = vld [vmem:[%s2048_s30 + $0x478] sm:$0xff]  ;;  %1296 = vst [vmem:[%s2063_s17 + $0x438] sm:$0xff] %v784_v17  ;;  %v790_v29 = vmul.f32 2.5, %v278_v26 }
  0x7f   : > { %1297 = vst [vmem:[%s2063_s17 + $0x440] sm:$0xff] %v785_v18  ;;  %1298 = vst [vmem:[%s2063_s17 + $0x448] sm:$0xff] %v786_v19  ;;  %v791_v30 = vmul.f32 2.5, %v279_v27  ;;  %v792_v31 = vmul.f32 2.5, %v280_v28  ;;  %v281_v32 = vld [vmem:[%s2048_s30 + $0x480] sm:$0xff]  ;;  %v282_v33 = vld [vmem:[%s2048_s30 + $0x488] sm:$0xff] }
  0x80   : > { %v283_v34 = vld [vmem:[%s2048_s30 + $0x490] sm:$0xff]  ;;  %1299 = vst [vmem:[%s2063_s17 + $0x450] sm:$0xff] %v787_v23  ;;  %1300 = vst [vmem:[%s2063_s17 + $0x458] sm:$0xff] %v788_v24  ;;  %v793_v35 = vmul.f32 2.5, %v281_v32  ;;  %v794_v36 = vmul.f32 2.5, %v282_v33  ;;  %v284_v38 = vld [vmem:[%s2048_s30 + $0x498] sm:$0xff] }
  0x81   : > { %1301 = vst [vmem:[%s2063_s17 + $0x460] sm:$0xff] %v789_v25  ;;  %v795_v37 = vmul.f32 2.5, %v283_v34  ;;  %v285_v39 = vld [vmem:[%s2048_s30 + $0x4a0] sm:$0xff]  ;;  %v286_v40 = vld [vmem:[%s2048_s30 + $0x4a8] sm:$0xff]  ;;  %1302 = vst [vmem:[%s2063_s17 + $0x468] sm:$0xff] %v790_v29  ;;  %v796_v41 = vmul.f32 2.5, %v284_v38 }
  0x82   : > { %1303 = vst [vmem:[%s2063_s17 + $0x470] sm:$0xff] %v791_v30  ;;  %1304 = vst [vmem:[%s2063_s17 + $0x478] sm:$0xff] %v792_v31  ;;  %v797_v42 = vmul.f32 2.5, %v285_v39  ;;  %v798_v43 = vmul.f32 2.5, %v286_v40  ;;  %v287_v44 = vld [vmem:[%s2048_s30 + $0x4b0] sm:$0xff]  ;;  %v288_v45 = vld [vmem:[%s2048_s30 + $0x4b8] sm:$0xff] }
  0x83   : > { %v289_v46 = vld [vmem:[%s2048_s30 + $0x4c0] sm:$0xff]  ;;  %1305 = vst [vmem:[%s2063_s17 + $0x480] sm:$0xff] %v793_v35  ;;  %1306 = vst [vmem:[%s2063_s17 + $0x488] sm:$0xff] %v794_v36  ;;  %v799_v47 = vmul.f32 2.5, %v287_v44  ;;  %v800_v48 = vmul.f32 2.5, %v288_v45  ;;  %v290_v50 = vld [vmem:[%s2048_s30 + $0x4c8] sm:$0xff] }
  0x84   : > { %1307 = vst [vmem:[%s2063_s17 + $0x490] sm:$0xff] %v795_v37  ;;  %v801_v49 = vmul.f32 2.5, %v289_v46  ;;  %v291_v51 = vld [vmem:[%s2048_s30 + $0x4d0] sm:$0xff]  ;;  %v292_v52 = vld [vmem:[%s2048_s30 + $0x4d8] sm:$0xff]  ;;  %1308 = vst [vmem:[%s2063_s17 + $0x498] sm:$0xff] %v796_v41  ;;  %v802_v53 = vmul.f32 2.5, %v290_v50 }
  0x85   : > { %1309 = vst [vmem:[%s2063_s17 + $0x4a0] sm:$0xff] %v797_v42  ;;  %1310 = vst [vmem:[%s2063_s17 + $0x4a8] sm:$0xff] %v798_v43  ;;  %v803_v54 = vmul.f32 2.5, %v291_v51  ;;  %v804_v55 = vmul.f32 2.5, %v292_v52  ;;  %v293_v56 = vld [vmem:[%s2048_s30 + $0x4e0] sm:$0xff]  ;;  %v294_v57 = vld [vmem:[%s2048_s30 + $0x4e8] sm:$0xff] }
  0x86   : > { %v295_v58 = vld [vmem:[%s2048_s30 + $0x4f0] sm:$0xff]  ;;  %1311 = vst [vmem:[%s2063_s17 + $0x4b0] sm:$0xff] %v799_v47  ;;  %1312 = vst [vmem:[%s2063_s17 + $0x4b8] sm:$0xff] %v800_v48  ;;  %v805_v59 = vmul.f32 2.5, %v293_v56  ;;  %v806_v60 = vmul.f32 2.5, %v294_v57  ;;  %v296_v62 = vld [vmem:[%s2048_s30 + $0x4f8] sm:$0xff] }
  0x87   : > { %1313 = vst [vmem:[%s2063_s17 + $0x4c0] sm:$0xff] %v801_v49  ;;  %v807_v61 = vmul.f32 2.5, %v295_v58  ;;  %v297_v63 = vld [vmem:[%s2048_s30 + $0x500] sm:$0xff]  ;;  %v298_v0 = vld [vmem:[%s2048_s30 + $0x508] sm:$0xff]  ;;  %1314 = vst [vmem:[%s2063_s17 + $0x4c8] sm:$0xff] %v802_v53  ;;  %v808_v1 = vmul.f32 2.5, %v296_v62 }
  0x88   : > { %1315 = vst [vmem:[%s2063_s17 + $0x4d0] sm:$0xff] %v803_v54  ;;  %1316 = vst [vmem:[%s2063_s17 + $0x4d8] sm:$0xff] %v804_v55  ;;  %v809_v2 = vmul.f32 2.5, %v297_v63  ;;  %v810_v3 = vmul.f32 2.5, %v298_v0  ;;  %v299_v4 = vld [vmem:[%s2048_s30 + $0x510] sm:$0xff]  ;;  %v300_v5 = vld [vmem:[%s2048_s30 + $0x518] sm:$0xff] }
  0x89   : > { %v301_v6 = vld [vmem:[%s2048_s30 + $0x520] sm:$0xff]  ;;  %1317 = vst [vmem:[%s2063_s17 + $0x4e0] sm:$0xff] %v805_v59  ;;  %1318 = vst [vmem:[%s2063_s17 + $0x4e8] sm:$0xff] %v806_v60  ;;  %v811_v7 = vmul.f32 2.5, %v299_v4  ;;  %v812_v8 = vmul.f32 2.5, %v300_v5  ;;  %v302_v10 = vld [vmem:[%s2048_s30 + $0x528] sm:$0xff] }
  0x8a   : > { %1319 = vst [vmem:[%s2063_s17 + $0x4f0] sm:$0xff] %v807_v61  ;;  %v813_v9 = vmul.f32 2.5, %v301_v6  ;;  %v303_v11 = vld [vmem:[%s2048_s30 + $0x530] sm:$0xff]  ;;  %v304_v12 = vld [vmem:[%s2048_s30 + $0x538] sm:$0xff]  ;;  %1320 = vst [vmem:[%s2063_s17 + $0x4f8] sm:$0xff] %v808_v1  ;;  %v814_v13 = vmul.f32 2.5, %v302_v10 }
  0x8b   : > { %1321 = vst [vmem:[%s2063_s17 + $0x500] sm:$0xff] %v809_v2  ;;  %1322 = vst [vmem:[%s2063_s17 + $0x508] sm:$0xff] %v810_v3  ;;  %v815_v14 = vmul.f32 2.5, %v303_v11  ;;  %v816_v15 = vmul.f32 2.5, %v304_v12  ;;  %v305_v16 = vld [vmem:[%s2048_s30 + $0x540] sm:$0xff]  ;;  %v306_v17 = vld [vmem:[%s2048_s30 + $0x548] sm:$0xff] }
  0x8c   : > { %v307_v18 = vld [vmem:[%s2048_s30 + $0x550] sm:$0xff]  ;;  %1323 = vst [vmem:[%s2063_s17 + $0x510] sm:$0xff] %v811_v7  ;;  %1324 = vst [vmem:[%s2063_s17 + $0x518] sm:$0xff] %v812_v8  ;;  %v817_v19 = vmul.f32 2.5, %v305_v16  ;;  %v818_v20 = vmul.f32 2.5, %v306_v17  ;;  %v308_v22 = vld [vmem:[%s2048_s30 + $0x558] sm:$0xff] }
  0x8d   : > { %1325 = vst [vmem:[%s2063_s17 + $0x520] sm:$0xff] %v813_v9  ;;  %v819_v21 = vmul.f32 2.5, %v307_v18  ;;  %v309_v23 = vld [vmem:[%s2048_s30 + $0x560] sm:$0xff]  ;;  %v310_v24 = vld [vmem:[%s2048_s30 + $0x568] sm:$0xff]  ;;  %1326 = vst [vmem:[%s2063_s17 + $0x528] sm:$0xff] %v814_v13  ;;  %v820_v25 = vmul.f32 2.5, %v308_v22 }
  0x8e   : > { %1327 = vst [vmem:[%s2063_s17 + $0x530] sm:$0xff] %v815_v14  ;;  %1328 = vst [vmem:[%s2063_s17 + $0x538] sm:$0xff] %v816_v15  ;;  %v821_v26 = vmul.f32 2.5, %v309_v23  ;;  %v822_v27 = vmul.f32 2.5, %v310_v24  ;;  %v311_v28 = vld [vmem:[%s2048_s30 + $0x570] sm:$0xff]  ;;  %v312_v29 = vld [vmem:[%s2048_s30 + $0x578] sm:$0xff] }
  0x8f   : > { %v313_v30 = vld [vmem:[%s2048_s30 + $0x580] sm:$0xff]  ;;  %1329 = vst [vmem:[%s2063_s17 + $0x540] sm:$0xff] %v817_v19  ;;  %1330 = vst [vmem:[%s2063_s17 + $0x548] sm:$0xff] %v818_v20  ;;  %v823_v31 = vmul.f32 2.5, %v311_v28  ;;  %v824_v32 = vmul.f32 2.5, %v312_v29  ;;  %v314_v34 = vld [vmem:[%s2048_s30 + $0x588] sm:$0xff] }
  0x90   : > { %1331 = vst [vmem:[%s2063_s17 + $0x550] sm:$0xff] %v819_v21  ;;  %v825_v33 = vmul.f32 2.5, %v313_v30  ;;  %v315_v35 = vld [vmem:[%s2048_s30 + $0x590] sm:$0xff]  ;;  %v316_v36 = vld [vmem:[%s2048_s30 + $0x598] sm:$0xff]  ;;  %1332 = vst [vmem:[%s2063_s17 + $0x558] sm:$0xff] %v820_v25  ;;  %v826_v37 = vmul.f32 2.5, %v314_v34 }
  0x91   : > { %1333 = vst [vmem:[%s2063_s17 + $0x560] sm:$0xff] %v821_v26  ;;  %1334 = vst [vmem:[%s2063_s17 + $0x568] sm:$0xff] %v822_v27  ;;  %v827_v38 = vmul.f32 2.5, %v315_v35  ;;  %v828_v39 = vmul.f32 2.5, %v316_v36  ;;  %v317_v40 = vld [vmem:[%s2048_s30 + $0x5a0] sm:$0xff]  ;;  %v318_v41 = vld [vmem:[%s2048_s30 + $0x5a8] sm:$0xff] }
  0x92   : > { %v319_v42 = vld [vmem:[%s2048_s30 + $0x5b0] sm:$0xff]  ;;  %1335 = vst [vmem:[%s2063_s17 + $0x570] sm:$0xff] %v823_v31  ;;  %1336 = vst [vmem:[%s2063_s17 + $0x578] sm:$0xff] %v824_v32  ;;  %v829_v43 = vmul.f32 2.5, %v317_v40  ;;  %v830_v44 = vmul.f32 2.5, %v318_v41  ;;  %v320_v46 = vld [vmem:[%s2048_s30 + $0x5b8] sm:$0xff] }
  0x93   : > { %1337 = vst [vmem:[%s2063_s17 + $0x580] sm:$0xff] %v825_v33  ;;  %v831_v45 = vmul.f32 2.5, %v319_v42  ;;  %v321_v47 = vld [vmem:[%s2048_s30 + $0x5c0] sm:$0xff]  ;;  %v322_v48 = vld [vmem:[%s2048_s30 + $0x5c8] sm:$0xff]  ;;  %1338 = vst [vmem:[%s2063_s17 + $0x588] sm:$0xff] %v826_v37  ;;  %v832_v49 = vmul.f32 2.5, %v320_v46 }
  0x94   : > { %1339 = vst [vmem:[%s2063_s17 + $0x590] sm:$0xff] %v827_v38  ;;  %1340 = vst [vmem:[%s2063_s17 + $0x598] sm:$0xff] %v828_v39  ;;  %v833_v50 = vmul.f32 2.5, %v321_v47  ;;  %v834_v51 = vmul.f32 2.5, %v322_v48  ;;  %v323_v52 = vld [vmem:[%s2048_s30 + $0x5d0] sm:$0xff]  ;;  %v324_v53 = vld [vmem:[%s2048_s30 + $0x5d8] sm:$0xff] }
  0x95   : > { %v325_v54 = vld [vmem:[%s2048_s30 + $0x5e0] sm:$0xff]  ;;  %1341 = vst [vmem:[%s2063_s17 + $0x5a0] sm:$0xff] %v829_v43  ;;  %1342 = vst [vmem:[%s2063_s17 + $0x5a8] sm:$0xff] %v830_v44  ;;  %v835_v55 = vmul.f32 2.5, %v323_v52  ;;  %v836_v56 = vmul.f32 2.5, %v324_v53  ;;  %v326_v58 = vld [vmem:[%s2048_s30 + $0x5e8] sm:$0xff] }
  0x96   : > { %1343 = vst [vmem:[%s2063_s17 + $0x5b0] sm:$0xff] %v831_v45  ;;  %v837_v57 = vmul.f32 2.5, %v325_v54  ;;  %v327_v59 = vld [vmem:[%s2048_s30 + $0x5f0] sm:$0xff]  ;;  %v328_v60 = vld [vmem:[%s2048_s30 + $0x5f8] sm:$0xff]  ;;  %1344 = vst [vmem:[%s2063_s17 + $0x5b8] sm:$0xff] %v832_v49  ;;  %v838_v61 = vmul.f32 2.5, %v326_v58 }
  0x97   : > { %1345 = vst [vmem:[%s2063_s17 + $0x5c0] sm:$0xff] %v833_v50  ;;  %1346 = vst [vmem:[%s2063_s17 + $0x5c8] sm:$0xff] %v834_v51  ;;  %v839_v62 = vmul.f32 2.5, %v327_v59  ;;  %v840_v63 = vmul.f32 2.5, %v328_v60  ;;  %v329_v0 = vld [vmem:[%s2048_s30 + $0x600] sm:$0xff]  ;;  %v330_v1 = vld [vmem:[%s2048_s30 + $0x608] sm:$0xff] }
  0x98   : > { %v331_v2 = vld [vmem:[%s2048_s30 + $0x610] sm:$0xff]  ;;  %1347 = vst [vmem:[%s2063_s17 + $0x5d0] sm:$0xff] %v835_v55  ;;  %1348 = vst [vmem:[%s2063_s17 + $0x5d8] sm:$0xff] %v836_v56  ;;  %v841_v3 = vmul.f32 2.5, %v329_v0  ;;  %v842_v4 = vmul.f32 2.5, %v330_v1  ;;  %v332_v6 = vld [vmem:[%s2048_s30 + $0x618] sm:$0xff] }
  0x99   : > { %1349 = vst [vmem:[%s2063_s17 + $0x5e0] sm:$0xff] %v837_v57  ;;  %v843_v5 = vmul.f32 2.5, %v331_v2  ;;  %v333_v7 = vld [vmem:[%s2048_s30 + $0x620] sm:$0xff]  ;;  %v334_v8 = vld [vmem:[%s2048_s30 + $0x628] sm:$0xff]  ;;  %1350 = vst [vmem:[%s2063_s17 + $0x5e8] sm:$0xff] %v838_v61  ;;  %v844_v9 = vmul.f32 2.5, %v332_v6 }
  0x9a   : > { %1351 = vst [vmem:[%s2063_s17 + $0x5f0] sm:$0xff] %v839_v62  ;;  %1352 = vst [vmem:[%s2063_s17 + $0x5f8] sm:$0xff] %v840_v63  ;;  %v845_v10 = vmul.f32 2.5, %v333_v7  ;;  %v846_v11 = vmul.f32 2.5, %v334_v8  ;;  %v335_v12 = vld [vmem:[%s2048_s30 + $0x630] sm:$0xff]  ;;  %v336_v13 = vld [vmem:[%s2048_s30 + $0x638] sm:$0xff] }
  0x9b   : > { %v337_v14 = vld [vmem:[%s2048_s30 + $0x640] sm:$0xff]  ;;  %1353 = vst [vmem:[%s2063_s17 + $0x600] sm:$0xff] %v841_v3  ;;  %1354 = vst [vmem:[%s2063_s17 + $0x608] sm:$0xff] %v842_v4  ;;  %v847_v15 = vmul.f32 2.5, %v335_v12  ;;  %v848_v16 = vmul.f32 2.5, %v336_v13  ;;  %v338_v18 = vld [vmem:[%s2048_s30 + $0x648] sm:$0xff] }
  0x9c   : > { %1355 = vst [vmem:[%s2063_s17 + $0x610] sm:$0xff] %v843_v5  ;;  %v849_v17 = vmul.f32 2.5, %v337_v14  ;;  %v339_v19 = vld [vmem:[%s2048_s30 + $0x650] sm:$0xff]  ;;  %v340_v20 = vld [vmem:[%s2048_s30 + $0x658] sm:$0xff]  ;;  %1356 = vst [vmem:[%s2063_s17 + $0x618] sm:$0xff] %v844_v9  ;;  %v850_v21 = vmul.f32 2.5, %v338_v18 }
  0x9d   : > { %1357 = vst [vmem:[%s2063_s17 + $0x620] sm:$0xff] %v845_v10  ;;  %1358 = vst [vmem:[%s2063_s17 + $0x628] sm:$0xff] %v846_v11  ;;  %v851_v22 = vmul.f32 2.5, %v339_v19  ;;  %v852_v23 = vmul.f32 2.5, %v340_v20  ;;  %v341_v24 = vld [vmem:[%s2048_s30 + $0x660] sm:$0xff]  ;;  %v342_v25 = vld [vmem:[%s2048_s30 + $0x668] sm:$0xff] }
  0x9e   : > { %v343_v26 = vld [vmem:[%s2048_s30 + $0x670] sm:$0xff]  ;;  %1359 = vst [vmem:[%s2063_s17 + $0x630] sm:$0xff] %v847_v15  ;;  %1360 = vst [vmem:[%s2063_s17 + $0x638] sm:$0xff] %v848_v16  ;;  %v853_v27 = vmul.f32 2.5, %v341_v24  ;;  %v854_v28 = vmul.f32 2.5, %v342_v25  ;;  %v344_v30 = vld [vmem:[%s2048_s30 + $0x678] sm:$0xff] }
  0x9f   : > { %1361 = vst [vmem:[%s2063_s17 + $0x640] sm:$0xff] %v849_v17  ;;  %v855_v29 = vmul.f32 2.5, %v343_v26  ;;  %v345_v31 = vld [vmem:[%s2048_s30 + $0x680] sm:$0xff]  ;;  %v346_v32 = vld [vmem:[%s2048_s30 + $0x688] sm:$0xff]  ;;  %1362 = vst [vmem:[%s2063_s17 + $0x648] sm:$0xff] %v850_v21  ;;  %v856_v33 = vmul.f32 2.5, %v344_v30 }
  0xa0   : > { %1363 = vst [vmem:[%s2063_s17 + $0x650] sm:$0xff] %v851_v22  ;;  %1364 = vst [vmem:[%s2063_s17 + $0x658] sm:$0xff] %v852_v23  ;;  %v857_v34 = vmul.f32 2.5, %v345_v31  ;;  %v858_v35 = vmul.f32 2.5, %v346_v32  ;;  %v347_v36 = vld [vmem:[%s2048_s30 + $0x690] sm:$0xff]  ;;  %v348_v37 = vld [vmem:[%s2048_s30 + $0x698] sm:$0xff] }
  0xa1   : > { %v349_v38 = vld [vmem:[%s2048_s30 + $0x6a0] sm:$0xff]  ;;  %1365 = vst [vmem:[%s2063_s17 + $0x660] sm:$0xff] %v853_v27  ;;  %1366 = vst [vmem:[%s2063_s17 + $0x668] sm:$0xff] %v854_v28  ;;  %v859_v39 = vmul.f32 2.5, %v347_v36  ;;  %v860_v40 = vmul.f32 2.5, %v348_v37  ;;  %v350_v42 = vld [vmem:[%s2048_s30 + $0x6a8] sm:$0xff] }
  0xa2   : > { %1367 = vst [vmem:[%s2063_s17 + $0x670] sm:$0xff] %v855_v29  ;;  %v861_v41 = vmul.f32 2.5, %v349_v38  ;;  %v351_v43 = vld [vmem:[%s2048_s30 + $0x6b0] sm:$0xff]  ;;  %v352_v44 = vld [vmem:[%s2048_s30 + $0x6b8] sm:$0xff]  ;;  %1368 = vst [vmem:[%s2063_s17 + $0x678] sm:$0xff] %v856_v33  ;;  %v862_v45 = vmul.f32 2.5, %v350_v42 }
  0xa3   : > { %1369 = vst [vmem:[%s2063_s17 + $0x680] sm:$0xff] %v857_v34  ;;  %1370 = vst [vmem:[%s2063_s17 + $0x688] sm:$0xff] %v858_v35  ;;  %v863_v46 = vmul.f32 2.5, %v351_v43  ;;  %v864_v47 = vmul.f32 2.5, %v352_v44  ;;  %v353_v48 = vld [vmem:[%s2048_s30 + $0x6c0] sm:$0xff]  ;;  %v354_v49 = vld [vmem:[%s2048_s30 + $0x6c8] sm:$0xff] }
  0xa4   : > { %v355_v50 = vld [vmem:[%s2048_s30 + $0x6d0] sm:$0xff]  ;;  %1371 = vst [vmem:[%s2063_s17 + $0x690] sm:$0xff] %v859_v39  ;;  %1372 = vst [vmem:[%s2063_s17 + $0x698] sm:$0xff] %v860_v40  ;;  %v865_v51 = vmul.f32 2.5, %v353_v48  ;;  %v866_v52 = vmul.f32 2.5, %v354_v49  ;;  %v356_v54 = vld [vmem:[%s2048_s30 + $0x6d8] sm:$0xff] }
  0xa5   : > { %1373 = vst [vmem:[%s2063_s17 + $0x6a0] sm:$0xff] %v861_v41  ;;  %v867_v53 = vmul.f32 2.5, %v355_v50  ;;  %v357_v55 = vld [vmem:[%s2048_s30 + $0x6e0] sm:$0xff]  ;;  %v358_v56 = vld [vmem:[%s2048_s30 + $0x6e8] sm:$0xff]  ;;  %1374 = vst [vmem:[%s2063_s17 + $0x6a8] sm:$0xff] %v862_v45  ;;  %v868_v57 = vmul.f32 2.5, %v356_v54 }
  0xa6   : > { %1375 = vst [vmem:[%s2063_s17 + $0x6b0] sm:$0xff] %v863_v46  ;;  %1376 = vst [vmem:[%s2063_s17 + $0x6b8] sm:$0xff] %v864_v47  ;;  %v869_v58 = vmul.f32 2.5, %v357_v55  ;;  %v870_v59 = vmul.f32 2.5, %v358_v56  ;;  %v359_v60 = vld [vmem:[%s2048_s30 + $0x6f0] sm:$0xff]  ;;  %v360_v61 = vld [vmem:[%s2048_s30 + $0x6f8] sm:$0xff] }
  0xa7   : > { %v361_v62 = vld [vmem:[%s2048_s30 + $0x700] sm:$0xff]  ;;  %1377 = vst [vmem:[%s2063_s17 + $0x6c0] sm:$0xff] %v865_v51  ;;  %1378 = vst [vmem:[%s2063_s17 + $0x6c8] sm:$0xff] %v866_v52  ;;  %v871_v63 = vmul.f32 2.5, %v359_v60  ;;  %v872_v0 = vmul.f32 2.5, %v360_v61  ;;  %v362_v2 = vld [vmem:[%s2048_s30 + $0x708] sm:$0xff] }
  0xa8   : > { %1379 = vst [vmem:[%s2063_s17 + $0x6d0] sm:$0xff] %v867_v53  ;;  %v873_v1 = vmul.f32 2.5, %v361_v62  ;;  %v363_v3 = vld [vmem:[%s2048_s30 + $0x710] sm:$0xff]  ;;  %v364_v4 = vld [vmem:[%s2048_s30 + $0x718] sm:$0xff]  ;;  %1380 = vst [vmem:[%s2063_s17 + $0x6d8] sm:$0xff] %v868_v57  ;;  %v874_v5 = vmul.f32 2.5, %v362_v2 }
  0xa9   : > { %1381 = vst [vmem:[%s2063_s17 + $0x6e0] sm:$0xff] %v869_v58  ;;  %1382 = vst [vmem:[%s2063_s17 + $0x6e8] sm:$0xff] %v870_v59  ;;  %v875_v6 = vmul.f32 2.5, %v363_v3  ;;  %v876_v7 = vmul.f32 2.5, %v364_v4  ;;  %v365_v8 = vld [vmem:[%s2048_s30 + $0x720] sm:$0xff]  ;;  %v366_v9 = vld [vmem:[%s2048_s30 + $0x728] sm:$0xff] }
  0xaa   : > { %v367_v10 = vld [vmem:[%s2048_s30 + $0x730] sm:$0xff]  ;;  %1383 = vst [vmem:[%s2063_s17 + $0x6f0] sm:$0xff] %v871_v63  ;;  %1384 = vst [vmem:[%s2063_s17 + $0x6f8] sm:$0xff] %v872_v0  ;;  %v877_v11 = vmul.f32 2.5, %v365_v8  ;;  %v878_v12 = vmul.f32 2.5, %v366_v9  ;;  %v368_v14 = vld [vmem:[%s2048_s30 + $0x738] sm:$0xff] }
  0xab   : > { %1385 = vst [vmem:[%s2063_s17 + $0x700] sm:$0xff] %v873_v1  ;;  %v879_v13 = vmul.f32 2.5, %v367_v10  ;;  %v369_v15 = vld [vmem:[%s2048_s30 + $0x740] sm:$0xff]  ;;  %v370_v16 = vld [vmem:[%s2048_s30 + $0x748] sm:$0xff]  ;;  %1386 = vst [vmem:[%s2063_s17 + $0x708] sm:$0xff] %v874_v5  ;;  %v880_v17 = vmul.f32 2.5, %v368_v14 }
  0xac   : > { %1387 = vst [vmem:[%s2063_s17 + $0x710] sm:$0xff] %v875_v6  ;;  %1388 = vst [vmem:[%s2063_s17 + $0x718] sm:$0xff] %v876_v7  ;;  %v881_v18 = vmul.f32 2.5, %v369_v15  ;;  %v882_v19 = vmul.f32 2.5, %v370_v16  ;;  %v371_v20 = vld [vmem:[%s2048_s30 + $0x750] sm:$0xff]  ;;  %v372_v21 = vld [vmem:[%s2048_s30 + $0x758] sm:$0xff] }
  0xad   : > { %v373_v22 = vld [vmem:[%s2048_s30 + $0x760] sm:$0xff]  ;;  %1389 = vst [vmem:[%s2063_s17 + $0x720] sm:$0xff] %v877_v11  ;;  %1390 = vst [vmem:[%s2063_s17 + $0x728] sm:$0xff] %v878_v12  ;;  %v883_v23 = vmul.f32 2.5, %v371_v20  ;;  %v884_v24 = vmul.f32 2.5, %v372_v21  ;;  %v374_v26 = vld [vmem:[%s2048_s30 + $0x768] sm:$0xff] }
  0xae   : > { %1391 = vst [vmem:[%s2063_s17 + $0x730] sm:$0xff] %v879_v13  ;;  %v885_v25 = vmul.f32 2.5, %v373_v22  ;;  %v375_v27 = vld [vmem:[%s2048_s30 + $0x770] sm:$0xff]  ;;  %v376_v28 = vld [vmem:[%s2048_s30 + $0x778] sm:$0xff]  ;;  %1392 = vst [vmem:[%s2063_s17 + $0x738] sm:$0xff] %v880_v17  ;;  %v886_v29 = vmul.f32 2.5, %v374_v26 }
  0xaf   : > { %1393 = vst [vmem:[%s2063_s17 + $0x740] sm:$0xff] %v881_v18  ;;  %1394 = vst [vmem:[%s2063_s17 + $0x748] sm:$0xff] %v882_v19  ;;  %v887_v30 = vmul.f32 2.5, %v375_v27  ;;  %v888_v31 = vmul.f32 2.5, %v376_v28  ;;  %v377_v32 = vld [vmem:[%s2048_s30 + $0x780] sm:$0xff]  ;;  %v378_v33 = vld [vmem:[%s2048_s30 + $0x788] sm:$0xff] }
  0xb0   : > { %v379_v34 = vld [vmem:[%s2048_s30 + $0x790] sm:$0xff]  ;;  %1395 = vst [vmem:[%s2063_s17 + $0x750] sm:$0xff] %v883_v23  ;;  %1396 = vst [vmem:[%s2063_s17 + $0x758] sm:$0xff] %v884_v24  ;;  %v889_v35 = vmul.f32 2.5, %v377_v32  ;;  %v890_v36 = vmul.f32 2.5, %v378_v33  ;;  %v380_v38 = vld [vmem:[%s2048_s30 + $0x798] sm:$0xff] }
  0xb1   : > { %1397 = vst [vmem:[%s2063_s17 + $0x760] sm:$0xff] %v885_v25  ;;  %v891_v37 = vmul.f32 2.5, %v379_v34  ;;  %v381_v39 = vld [vmem:[%s2048_s30 + $0x7a0] sm:$0xff]  ;;  %v382_v40 = vld [vmem:[%s2048_s30 + $0x7a8] sm:$0xff]  ;;  %1398 = vst [vmem:[%s2063_s17 + $0x768] sm:$0xff] %v886_v29  ;;  %v892_v41 = vmul.f32 2.5, %v380_v38 }
  0xb2   : > { %1399 = vst [vmem:[%s2063_s17 + $0x770] sm:$0xff] %v887_v30  ;;  %1400 = vst [vmem:[%s2063_s17 + $0x778] sm:$0xff] %v888_v31  ;;  %v893_v42 = vmul.f32 2.5, %v381_v39  ;;  %v894_v43 = vmul.f32 2.5, %v382_v40  ;;  %v383_v44 = vld [vmem:[%s2048_s30 + $0x7b0] sm:$0xff]  ;;  %v384_v45 = vld [vmem:[%s2048_s30 + $0x7b8] sm:$0xff] }
  0xb3   : > { %v385_v46 = vld [vmem:[%s2048_s30 + $0x7c0] sm:$0xff]  ;;  %1401 = vst [vmem:[%s2063_s17 + $0x780] sm:$0xff] %v889_v35  ;;  %1402 = vst [vmem:[%s2063_s17 + $0x788] sm:$0xff] %v890_v36  ;;  %v895_v47 = vmul.f32 2.5, %v383_v44  ;;  %v896_v48 = vmul.f32 2.5, %v384_v45  ;;  %v386_v50 = vld [vmem:[%s2048_s30 + $0x7c8] sm:$0xff] }
  0xb4   : > { %1403 = vst [vmem:[%s2063_s17 + $0x790] sm:$0xff] %v891_v37  ;;  %v897_v49 = vmul.f32 2.5, %v385_v46  ;;  %v387_v51 = vld [vmem:[%s2048_s30 + $0x7d0] sm:$0xff]  ;;  %v388_v52 = vld [vmem:[%s2048_s30 + $0x7d8] sm:$0xff]  ;;  %1404 = vst [vmem:[%s2063_s17 + $0x798] sm:$0xff] %v892_v41  ;;  %v898_v53 = vmul.f32 2.5, %v386_v50 }
  0xb5   : > { %1405 = vst [vmem:[%s2063_s17 + $0x7a0] sm:$0xff] %v893_v42  ;;  %1406 = vst [vmem:[%s2063_s17 + $0x7a8] sm:$0xff] %v894_v43  ;;  %v899_v54 = vmul.f32 2.5, %v387_v51  ;;  %v900_v55 = vmul.f32 2.5, %v388_v52  ;;  %v389_v56 = vld [vmem:[%s2048_s30 + $0x7e0] sm:$0xff]  ;;  %v390_v57 = vld [vmem:[%s2048_s30 + $0x7e8] sm:$0xff] }
  0xb6   : > { %v391_v58 = vld [vmem:[%s2048_s30 + $0x7f0] sm:$0xff]  ;;  %1407 = vst [vmem:[%s2063_s17 + $0x7b0] sm:$0xff] %v895_v47  ;;  %1408 = vst [vmem:[%s2063_s17 + $0x7b8] sm:$0xff] %v896_v48  ;;  %v901_v59 = vmul.f32 2.5, %v389_v56  ;;  %v902_v60 = vmul.f32 2.5, %v390_v57  ;;  %v392_v62 = vld [vmem:[%s2048_s30 + $0x7f8] sm:$0xff] }
  0xb7   : > { %1409 = vst [vmem:[%s2063_s17 + $0x7c0] sm:$0xff] %v897_v49  ;;  %v903_v61 = vmul.f32 2.5, %v391_v58  ;;  %v393_v63 = vld [vmem:[%s2048_s30 + $0x800] sm:$0xff]  ;;  %v394_v0 = vld [vmem:[%s2048_s30 + $0x808] sm:$0xff]  ;;  %1410 = vst [vmem:[%s2063_s17 + $0x7c8] sm:$0xff] %v898_v53  ;;  %v904_v1 = vmul.f32 2.5, %v392_v62 }
  0xb8   : > { %1411 = vst [vmem:[%s2063_s17 + $0x7d0] sm:$0xff] %v899_v54  ;;  %1412 = vst [vmem:[%s2063_s17 + $0x7d8] sm:$0xff] %v900_v55  ;;  %v905_v2 = vmul.f32 2.5, %v393_v63  ;;  %v906_v3 = vmul.f32 2.5, %v394_v0  ;;  %v395_v4 = vld [vmem:[%s2048_s30 + $0x810] sm:$0xff]  ;;  %v396_v5 = vld [vmem:[%s2048_s30 + $0x818] sm:$0xff] }
  0xb9   : > { %v397_v6 = vld [vmem:[%s2048_s30 + $0x820] sm:$0xff]  ;;  %1413 = vst [vmem:[%s2063_s17 + $0x7e0] sm:$0xff] %v901_v59  ;;  %1414 = vst [vmem:[%s2063_s17 + $0x7e8] sm:$0xff] %v902_v60  ;;  %v907_v7 = vmul.f32 2.5, %v395_v4  ;;  %v908_v8 = vmul.f32 2.5, %v396_v5  ;;  %v398_v10 = vld [vmem:[%s2048_s30 + $0x828] sm:$0xff] }
  0xba   : > { %1415 = vst [vmem:[%s2063_s17 + $0x7f0] sm:$0xff] %v903_v61  ;;  %v909_v9 = vmul.f32 2.5, %v397_v6  ;;  %v399_v11 = vld [vmem:[%s2048_s30 + $0x830] sm:$0xff]  ;;  %v400_v12 = vld [vmem:[%s2048_s30 + $0x838] sm:$0xff]  ;;  %1416 = vst [vmem:[%s2063_s17 + $0x7f8] sm:$0xff] %v904_v1  ;;  %v910_v13 = vmul.f32 2.5, %v398_v10 }
  0xbb   : > { %1417 = vst [vmem:[%s2063_s17 + $0x800] sm:$0xff] %v905_v2  ;;  %1418 = vst [vmem:[%s2063_s17 + $0x808] sm:$0xff] %v906_v3  ;;  %v911_v14 = vmul.f32 2.5, %v399_v11  ;;  %v912_v15 = vmul.f32 2.5, %v400_v12  ;;  %v401_v16 = vld [vmem:[%s2048_s30 + $0x840] sm:$0xff]  ;;  %v402_v17 = vld [vmem:[%s2048_s30 + $0x848] sm:$0xff] }
  0xbc   : > { %v403_v18 = vld [vmem:[%s2048_s30 + $0x850] sm:$0xff]  ;;  %1419 = vst [vmem:[%s2063_s17 + $0x810] sm:$0xff] %v907_v7  ;;  %1420 = vst [vmem:[%s2063_s17 + $0x818] sm:$0xff] %v908_v8  ;;  %v913_v19 = vmul.f32 2.5, %v401_v16  ;;  %v914_v20 = vmul.f32 2.5, %v402_v17  ;;  %v404_v22 = vld [vmem:[%s2048_s30 + $0x858] sm:$0xff] }
  0xbd   : > { %1421 = vst [vmem:[%s2063_s17 + $0x820] sm:$0xff] %v909_v9  ;;  %v915_v21 = vmul.f32 2.5, %v403_v18  ;;  %v405_v23 = vld [vmem:[%s2048_s30 + $0x860] sm:$0xff]  ;;  %v406_v24 = vld [vmem:[%s2048_s30 + $0x868] sm:$0xff]  ;;  %1422 = vst [vmem:[%s2063_s17 + $0x828] sm:$0xff] %v910_v13  ;;  %v916_v25 = vmul.f32 2.5, %v404_v22 }
  0xbe   : > { %1423 = vst [vmem:[%s2063_s17 + $0x830] sm:$0xff] %v911_v14  ;;  %1424 = vst [vmem:[%s2063_s17 + $0x838] sm:$0xff] %v912_v15  ;;  %v917_v26 = vmul.f32 2.5, %v405_v23  ;;  %v918_v27 = vmul.f32 2.5, %v406_v24  ;;  %v407_v28 = vld [vmem:[%s2048_s30 + $0x870] sm:$0xff]  ;;  %v408_v29 = vld [vmem:[%s2048_s30 + $0x878] sm:$0xff] }
  0xbf   : > { %v409_v30 = vld [vmem:[%s2048_s30 + $0x880] sm:$0xff]  ;;  %1425 = vst [vmem:[%s2063_s17 + $0x840] sm:$0xff] %v913_v19  ;;  %1426 = vst [vmem:[%s2063_s17 + $0x848] sm:$0xff] %v914_v20  ;;  %v919_v31 = vmul.f32 2.5, %v407_v28  ;;  %v920_v32 = vmul.f32 2.5, %v408_v29  ;;  %v410_v34 = vld [vmem:[%s2048_s30 + $0x888] sm:$0xff] }
  0xc0   : > { %1427 = vst [vmem:[%s2063_s17 + $0x850] sm:$0xff] %v915_v21  ;;  %v921_v33 = vmul.f32 2.5, %v409_v30  ;;  %v411_v35 = vld [vmem:[%s2048_s30 + $0x890] sm:$0xff]  ;;  %v412_v36 = vld [vmem:[%s2048_s30 + $0x898] sm:$0xff]  ;;  %1428 = vst [vmem:[%s2063_s17 + $0x858] sm:$0xff] %v916_v25  ;;  %v922_v37 = vmul.f32 2.5, %v410_v34 }
  0xc1   : > { %1429 = vst [vmem:[%s2063_s17 + $0x860] sm:$0xff] %v917_v26  ;;  %1430 = vst [vmem:[%s2063_s17 + $0x868] sm:$0xff] %v918_v27  ;;  %v923_v38 = vmul.f32 2.5, %v411_v35  ;;  %v924_v39 = vmul.f32 2.5, %v412_v36  ;;  %v413_v40 = vld [vmem:[%s2048_s30 + $0x8a0] sm:$0xff]  ;;  %v414_v41 = vld [vmem:[%s2048_s30 + $0x8a8] sm:$0xff] }
  0xc2   : > { %v415_v42 = vld [vmem:[%s2048_s30 + $0x8b0] sm:$0xff]  ;;  %1431 = vst [vmem:[%s2063_s17 + $0x870] sm:$0xff] %v919_v31  ;;  %1432 = vst [vmem:[%s2063_s17 + $0x878] sm:$0xff] %v920_v32  ;;  %v925_v43 = vmul.f32 2.5, %v413_v40  ;;  %v926_v44 = vmul.f32 2.5, %v414_v41  ;;  %v416_v46 = vld [vmem:[%s2048_s30 + $0x8b8] sm:$0xff] }
  0xc3   : > { %1433 = vst [vmem:[%s2063_s17 + $0x880] sm:$0xff] %v921_v33  ;;  %v927_v45 = vmul.f32 2.5, %v415_v42  ;;  %v417_v47 = vld [vmem:[%s2048_s30 + $0x8c0] sm:$0xff]  ;;  %v418_v48 = vld [vmem:[%s2048_s30 + $0x8c8] sm:$0xff]  ;;  %1434 = vst [vmem:[%s2063_s17 + $0x888] sm:$0xff] %v922_v37  ;;  %v928_v49 = vmul.f32 2.5, %v416_v46 }
  0xc4   : > { %1435 = vst [vmem:[%s2063_s17 + $0x890] sm:$0xff] %v923_v38  ;;  %1436 = vst [vmem:[%s2063_s17 + $0x898] sm:$0xff] %v924_v39  ;;  %v929_v50 = vmul.f32 2.5, %v417_v47  ;;  %v930_v51 = vmul.f32 2.5, %v418_v48  ;;  %v419_v52 = vld [vmem:[%s2048_s30 + $0x8d0] sm:$0xff]  ;;  %v420_v53 = vld [vmem:[%s2048_s30 + $0x8d8] sm:$0xff] }
  0xc5   : > { %v421_v54 = vld [vmem:[%s2048_s30 + $0x8e0] sm:$0xff]  ;;  %1437 = vst [vmem:[%s2063_s17 + $0x8a0] sm:$0xff] %v925_v43  ;;  %1438 = vst [vmem:[%s2063_s17 + $0x8a8] sm:$0xff] %v926_v44  ;;  %v931_v55 = vmul.f32 2.5, %v419_v52  ;;  %v932_v56 = vmul.f32 2.5, %v420_v53  ;;  %v422_v58 = vld [vmem:[%s2048_s30 + $0x8e8] sm:$0xff] }
  0xc6   : > { %1439 = vst [vmem:[%s2063_s17 + $0x8b0] sm:$0xff] %v927_v45  ;;  %v933_v57 = vmul.f32 2.5, %v421_v54  ;;  %v423_v59 = vld [vmem:[%s2048_s30 + $0x8f0] sm:$0xff]  ;;  %v424_v60 = vld [vmem:[%s2048_s30 + $0x8f8] sm:$0xff]  ;;  %1440 = vst [vmem:[%s2063_s17 + $0x8b8] sm:$0xff] %v928_v49  ;;  %v934_v61 = vmul.f32 2.5, %v422_v58 }
  0xc7   : > { %1441 = vst [vmem:[%s2063_s17 + $0x8c0] sm:$0xff] %v929_v50  ;;  %1442 = vst [vmem:[%s2063_s17 + $0x8c8] sm:$0xff] %v930_v51  ;;  %v935_v62 = vmul.f32 2.5, %v423_v59  ;;  %v936_v63 = vmul.f32 2.5, %v424_v60  ;;  %v425_v0 = vld [vmem:[%s2048_s30 + $0x900] sm:$0xff]  ;;  %v426_v1 = vld [vmem:[%s2048_s30 + $0x908] sm:$0xff] }
  0xc8   : > { %v427_v2 = vld [vmem:[%s2048_s30 + $0x910] sm:$0xff]  ;;  %1443 = vst [vmem:[%s2063_s17 + $0x8d0] sm:$0xff] %v931_v55  ;;  %1444 = vst [vmem:[%s2063_s17 + $0x8d8] sm:$0xff] %v932_v56  ;;  %v937_v3 = vmul.f32 2.5, %v425_v0  ;;  %v938_v4 = vmul.f32 2.5, %v426_v1  ;;  %v428_v6 = vld [vmem:[%s2048_s30 + $0x918] sm:$0xff] }
  0xc9   : > { %1445 = vst [vmem:[%s2063_s17 + $0x8e0] sm:$0xff] %v933_v57  ;;  %v939_v5 = vmul.f32 2.5, %v427_v2  ;;  %v429_v7 = vld [vmem:[%s2048_s30 + $0x920] sm:$0xff]  ;;  %v430_v8 = vld [vmem:[%s2048_s30 + $0x928] sm:$0xff]  ;;  %1446 = vst [vmem:[%s2063_s17 + $0x8e8] sm:$0xff] %v934_v61  ;;  %v940_v9 = vmul.f32 2.5, %v428_v6 }
  0xca   : > { %1447 = vst [vmem:[%s2063_s17 + $0x8f0] sm:$0xff] %v935_v62  ;;  %1448 = vst [vmem:[%s2063_s17 + $0x8f8] sm:$0xff] %v936_v63  ;;  %v941_v10 = vmul.f32 2.5, %v429_v7  ;;  %v942_v11 = vmul.f32 2.5, %v430_v8  ;;  %v431_v12 = vld [vmem:[%s2048_s30 + $0x930] sm:$0xff]  ;;  %v432_v13 = vld [vmem:[%s2048_s30 + $0x938] sm:$0xff] }
  0xcb   : > { %v433_v14 = vld [vmem:[%s2048_s30 + $0x940] sm:$0xff]  ;;  %1449 = vst [vmem:[%s2063_s17 + $0x900] sm:$0xff] %v937_v3  ;;  %1450 = vst [vmem:[%s2063_s17 + $0x908] sm:$0xff] %v938_v4  ;;  %v943_v15 = vmul.f32 2.5, %v431_v12  ;;  %v944_v16 = vmul.f32 2.5, %v432_v13  ;;  %v434_v18 = vld [vmem:[%s2048_s30 + $0x948] sm:$0xff] }
  0xcc   : > { %1451 = vst [vmem:[%s2063_s17 + $0x910] sm:$0xff] %v939_v5  ;;  %v945_v17 = vmul.f32 2.5, %v433_v14  ;;  %v435_v19 = vld [vmem:[%s2048_s30 + $0x950] sm:$0xff]  ;;  %v436_v20 = vld [vmem:[%s2048_s30 + $0x958] sm:$0xff]  ;;  %1452 = vst [vmem:[%s2063_s17 + $0x918] sm:$0xff] %v940_v9  ;;  %v946_v21 = vmul.f32 2.5, %v434_v18 }
  0xcd   : > { %1453 = vst [vmem:[%s2063_s17 + $0x920] sm:$0xff] %v941_v10  ;;  %1454 = vst [vmem:[%s2063_s17 + $0x928] sm:$0xff] %v942_v11  ;;  %v947_v22 = vmul.f32 2.5, %v435_v19  ;;  %v948_v23 = vmul.f32 2.5, %v436_v20  ;;  %v437_v24 = vld [vmem:[%s2048_s30 + $0x960] sm:$0xff]  ;;  %v438_v25 = vld [vmem:[%s2048_s30 + $0x968] sm:$0xff] }
  0xce   : > { %v439_v26 = vld [vmem:[%s2048_s30 + $0x970] sm:$0xff]  ;;  %1455 = vst [vmem:[%s2063_s17 + $0x930] sm:$0xff] %v943_v15  ;;  %1456 = vst [vmem:[%s2063_s17 + $0x938] sm:$0xff] %v944_v16  ;;  %v949_v27 = vmul.f32 2.5, %v437_v24  ;;  %v950_v28 = vmul.f32 2.5, %v438_v25  ;;  %v440_v30 = vld [vmem:[%s2048_s30 + $0x978] sm:$0xff] }
  0xcf   : > { %1457 = vst [vmem:[%s2063_s17 + $0x940] sm:$0xff] %v945_v17  ;;  %v951_v29 = vmul.f32 2.5, %v439_v26  ;;  %v441_v31 = vld [vmem:[%s2048_s30 + $0x980] sm:$0xff]  ;;  %v442_v32 = vld [vmem:[%s2048_s30 + $0x988] sm:$0xff]  ;;  %1458 = vst [vmem:[%s2063_s17 + $0x948] sm:$0xff] %v946_v21  ;;  %v952_v33 = vmul.f32 2.5, %v440_v30 }
  0xd0   : > { %1459 = vst [vmem:[%s2063_s17 + $0x950] sm:$0xff] %v947_v22  ;;  %1460 = vst [vmem:[%s2063_s17 + $0x958] sm:$0xff] %v948_v23  ;;  %v953_v34 = vmul.f32 2.5, %v441_v31  ;;  %v954_v35 = vmul.f32 2.5, %v442_v32  ;;  %v443_v36 = vld [vmem:[%s2048_s30 + $0x990] sm:$0xff]  ;;  %v444_v37 = vld [vmem:[%s2048_s30 + $0x998] sm:$0xff] }
  0xd1   : > { %v445_v38 = vld [vmem:[%s2048_s30 + $0x9a0] sm:$0xff]  ;;  %1461 = vst [vmem:[%s2063_s17 + $0x960] sm:$0xff] %v949_v27  ;;  %1462 = vst [vmem:[%s2063_s17 + $0x968] sm:$0xff] %v950_v28  ;;  %v955_v39 = vmul.f32 2.5, %v443_v36  ;;  %v956_v40 = vmul.f32 2.5, %v444_v37  ;;  %v446_v42 = vld [vmem:[%s2048_s30 + $0x9a8] sm:$0xff] }
  0xd2   : > { %1463 = vst [vmem:[%s2063_s17 + $0x970] sm:$0xff] %v951_v29  ;;  %v957_v41 = vmul.f32 2.5, %v445_v38  ;;  %v447_v43 = vld [vmem:[%s2048_s30 + $0x9b0] sm:$0xff]  ;;  %v448_v44 = vld [vmem:[%s2048_s30 + $0x9b8] sm:$0xff]  ;;  %1464 = vst [vmem:[%s2063_s17 + $0x978] sm:$0xff] %v952_v33  ;;  %v958_v45 = vmul.f32 2.5, %v446_v42 }
  0xd3   : > { %1465 = vst [vmem:[%s2063_s17 + $0x980] sm:$0xff] %v953_v34  ;;  %1466 = vst [vmem:[%s2063_s17 + $0x988] sm:$0xff] %v954_v35  ;;  %v959_v46 = vmul.f32 2.5, %v447_v43  ;;  %v960_v47 = vmul.f32 2.5, %v448_v44  ;;  %v449_v48 = vld [vmem:[%s2048_s30 + $0x9c0] sm:$0xff]  ;;  %v450_v49 = vld [vmem:[%s2048_s30 + $0x9c8] sm:$0xff] }
  0xd4   : > { %v451_v50 = vld [vmem:[%s2048_s30 + $0x9d0] sm:$0xff]  ;;  %1467 = vst [vmem:[%s2063_s17 + $0x990] sm:$0xff] %v955_v39  ;;  %1468 = vst [vmem:[%s2063_s17 + $0x998] sm:$0xff] %v956_v40  ;;  %v961_v51 = vmul.f32 2.5, %v449_v48  ;;  %v962_v52 = vmul.f32 2.5, %v450_v49  ;;  %v452_v54 = vld [vmem:[%s2048_s30 + $0x9d8] sm:$0xff] }
  0xd5   : > { %1469 = vst [vmem:[%s2063_s17 + $0x9a0] sm:$0xff] %v957_v41  ;;  %v963_v53 = vmul.f32 2.5, %v451_v50  ;;  %v453_v55 = vld [vmem:[%s2048_s30 + $0x9e0] sm:$0xff]  ;;  %v454_v56 = vld [vmem:[%s2048_s30 + $0x9e8] sm:$0xff]  ;;  %1470 = vst [vmem:[%s2063_s17 + $0x9a8] sm:$0xff] %v958_v45  ;;  %v964_v57 = vmul.f32 2.5, %v452_v54 }
  0xd6   : > { %1471 = vst [vmem:[%s2063_s17 + $0x9b0] sm:$0xff] %v959_v46  ;;  %1472 = vst [vmem:[%s2063_s17 + $0x9b8] sm:$0xff] %v960_v47  ;;  %v965_v58 = vmul.f32 2.5, %v453_v55  ;;  %v966_v59 = vmul.f32 2.5, %v454_v56  ;;  %v455_v60 = vld [vmem:[%s2048_s30 + $0x9f0] sm:$0xff]  ;;  %v456_v61 = vld [vmem:[%s2048_s30 + $0x9f8] sm:$0xff] }
  0xd7   : > { %v457_v62 = vld [vmem:[%s2048_s30 + $0xa00] sm:$0xff]  ;;  %1473 = vst [vmem:[%s2063_s17 + $0x9c0] sm:$0xff] %v961_v51  ;;  %1474 = vst [vmem:[%s2063_s17 + $0x9c8] sm:$0xff] %v962_v52  ;;  %v967_v63 = vmul.f32 2.5, %v455_v60  ;;  %v968_v0 = vmul.f32 2.5, %v456_v61  ;;  %v458_v2 = vld [vmem:[%s2048_s30 + $0xa08] sm:$0xff] }
  0xd8   : > { %1475 = vst [vmem:[%s2063_s17 + $0x9d0] sm:$0xff] %v963_v53  ;;  %v969_v1 = vmul.f32 2.5, %v457_v62  ;;  %v459_v3 = vld [vmem:[%s2048_s30 + $0xa10] sm:$0xff]  ;;  %v460_v4 = vld [vmem:[%s2048_s30 + $0xa18] sm:$0xff]  ;;  %1476 = vst [vmem:[%s2063_s17 + $0x9d8] sm:$0xff] %v964_v57  ;;  %v970_v5 = vmul.f32 2.5, %v458_v2 }
  0xd9   : > { %1477 = vst [vmem:[%s2063_s17 + $0x9e0] sm:$0xff] %v965_v58  ;;  %1478 = vst [vmem:[%s2063_s17 + $0x9e8] sm:$0xff] %v966_v59  ;;  %v971_v6 = vmul.f32 2.5, %v459_v3  ;;  %v972_v7 = vmul.f32 2.5, %v460_v4  ;;  %v461_v8 = vld [vmem:[%s2048_s30 + $0xa20] sm:$0xff]  ;;  %v462_v9 = vld [vmem:[%s2048_s30 + $0xa28] sm:$0xff] }
  0xda   : > { %v463_v10 = vld [vmem:[%s2048_s30 + $0xa30] sm:$0xff]  ;;  %1479 = vst [vmem:[%s2063_s17 + $0x9f0] sm:$0xff] %v967_v63  ;;  %1480 = vst [vmem:[%s2063_s17 + $0x9f8] sm:$0xff] %v968_v0  ;;  %v973_v11 = vmul.f32 2.5, %v461_v8  ;;  %v974_v12 = vmul.f32 2.5, %v462_v9  ;;  %v464_v14 = vld [vmem:[%s2048_s30 + $0xa38] sm:$0xff] }
  0xdb   : > { %1481 = vst [vmem:[%s2063_s17 + $0xa00] sm:$0xff] %v969_v1  ;;  %v975_v13 = vmul.f32 2.5, %v463_v10  ;;  %v465_v15 = vld [vmem:[%s2048_s30 + $0xa40] sm:$0xff]  ;;  %v466_v16 = vld [vmem:[%s2048_s30 + $0xa48] sm:$0xff]  ;;  %1482 = vst [vmem:[%s2063_s17 + $0xa08] sm:$0xff] %v970_v5  ;;  %v976_v17 = vmul.f32 2.5, %v464_v14 }
  0xdc   : > { %1483 = vst [vmem:[%s2063_s17 + $0xa10] sm:$0xff] %v971_v6  ;;  %1484 = vst [vmem:[%s2063_s17 + $0xa18] sm:$0xff] %v972_v7  ;;  %v977_v18 = vmul.f32 2.5, %v465_v15  ;;  %v978_v19 = vmul.f32 2.5, %v466_v16  ;;  %v467_v20 = vld [vmem:[%s2048_s30 + $0xa50] sm:$0xff]  ;;  %v468_v21 = vld [vmem:[%s2048_s30 + $0xa58] sm:$0xff] }
  0xdd   : > { %v469_v22 = vld [vmem:[%s2048_s30 + $0xa60] sm:$0xff]  ;;  %1485 = vst [vmem:[%s2063_s17 + $0xa20] sm:$0xff] %v973_v11  ;;  %1486 = vst [vmem:[%s2063_s17 + $0xa28] sm:$0xff] %v974_v12  ;;  %v979_v23 = vmul.f32 2.5, %v467_v20  ;;  %v980_v24 = vmul.f32 2.5, %v468_v21  ;;  %v470_v26 = vld [vmem:[%s2048_s30 + $0xa68] sm:$0xff] }
  0xde   : > { %1487 = vst [vmem:[%s2063_s17 + $0xa30] sm:$0xff] %v975_v13  ;;  %v981_v25 = vmul.f32 2.5, %v469_v22  ;;  %v471_v27 = vld [vmem:[%s2048_s30 + $0xa70] sm:$0xff]  ;;  %v472_v28 = vld [vmem:[%s2048_s30 + $0xa78] sm:$0xff]  ;;  %1488 = vst [vmem:[%s2063_s17 + $0xa38] sm:$0xff] %v976_v17  ;;  %v982_v29 = vmul.f32 2.5, %v470_v26 }
  0xdf   : > { %1489 = vst [vmem:[%s2063_s17 + $0xa40] sm:$0xff] %v977_v18  ;;  %1490 = vst [vmem:[%s2063_s17 + $0xa48] sm:$0xff] %v978_v19  ;;  %v983_v30 = vmul.f32 2.5, %v471_v27  ;;  %v984_v31 = vmul.f32 2.5, %v472_v28  ;;  %v473_v32 = vld [vmem:[%s2048_s30 + $0xa80] sm:$0xff]  ;;  %v474_v33 = vld [vmem:[%s2048_s30 + $0xa88] sm:$0xff] }
  0xe0   : > { %v475_v34 = vld [vmem:[%s2048_s30 + $0xa90] sm:$0xff]  ;;  %1491 = vst [vmem:[%s2063_s17 + $0xa50] sm:$0xff] %v979_v23  ;;  %1492 = vst [vmem:[%s2063_s17 + $0xa58] sm:$0xff] %v980_v24  ;;  %v985_v35 = vmul.f32 2.5, %v473_v32  ;;  %v986_v36 = vmul.f32 2.5, %v474_v33  ;;  %v476_v38 = vld [vmem:[%s2048_s30 + $0xa98] sm:$0xff] }
  0xe1   : > { %1493 = vst [vmem:[%s2063_s17 + $0xa60] sm:$0xff] %v981_v25  ;;  %v987_v37 = vmul.f32 2.5, %v475_v34  ;;  %v477_v39 = vld [vmem:[%s2048_s30 + $0xaa0] sm:$0xff]  ;;  %v478_v40 = vld [vmem:[%s2048_s30 + $0xaa8] sm:$0xff]  ;;  %1494 = vst [vmem:[%s2063_s17 + $0xa68] sm:$0xff] %v982_v29  ;;  %v988_v41 = vmul.f32 2.5, %v476_v38 }
  0xe2   : > { %1495 = vst [vmem:[%s2063_s17 + $0xa70] sm:$0xff] %v983_v30  ;;  %1496 = vst [vmem:[%s2063_s17 + $0xa78] sm:$0xff] %v984_v31  ;;  %v989_v42 = vmul.f32 2.5, %v477_v39  ;;  %v990_v43 = vmul.f32 2.5, %v478_v40  ;;  %v479_v44 = vld [vmem:[%s2048_s30 + $0xab0] sm:$0xff]  ;;  %v480_v45 = vld [vmem:[%s2048_s30 + $0xab8] sm:$0xff] }
  0xe3   : > { %v481_v46 = vld [vmem:[%s2048_s30 + $0xac0] sm:$0xff]  ;;  %1497 = vst [vmem:[%s2063_s17 + $0xa80] sm:$0xff] %v985_v35  ;;  %1498 = vst [vmem:[%s2063_s17 + $0xa88] sm:$0xff] %v986_v36  ;;  %v991_v47 = vmul.f32 2.5, %v479_v44  ;;  %v992_v48 = vmul.f32 2.5, %v480_v45  ;;  %v482_v50 = vld [vmem:[%s2048_s30 + $0xac8] sm:$0xff] }
  0xe4   : > { %1499 = vst [vmem:[%s2063_s17 + $0xa90] sm:$0xff] %v987_v37  ;;  %v993_v49 = vmul.f32 2.5, %v481_v46  ;;  %v483_v51 = vld [vmem:[%s2048_s30 + $0xad0] sm:$0xff]  ;;  %v484_v52 = vld [vmem:[%s2048_s30 + $0xad8] sm:$0xff]  ;;  %1500 = vst [vmem:[%s2063_s17 + $0xa98] sm:$0xff] %v988_v41  ;;  %v994_v53 = vmul.f32 2.5, %v482_v50 }
  0xe5   : > { %1501 = vst [vmem:[%s2063_s17 + $0xaa0] sm:$0xff] %v989_v42  ;;  %1502 = vst [vmem:[%s2063_s17 + $0xaa8] sm:$0xff] %v990_v43  ;;  %v995_v54 = vmul.f32 2.5, %v483_v51  ;;  %v996_v55 = vmul.f32 2.5, %v484_v52  ;;  %v485_v56 = vld [vmem:[%s2048_s30 + $0xae0] sm:$0xff]  ;;  %v486_v57 = vld [vmem:[%s2048_s30 + $0xae8] sm:$0xff] }
  0xe6   : > { %v487_v58 = vld [vmem:[%s2048_s30 + $0xaf0] sm:$0xff]  ;;  %1503 = vst [vmem:[%s2063_s17 + $0xab0] sm:$0xff] %v991_v47  ;;  %1504 = vst [vmem:[%s2063_s17 + $0xab8] sm:$0xff] %v992_v48  ;;  %v997_v59 = vmul.f32 2.5, %v485_v56  ;;  %v998_v60 = vmul.f32 2.5, %v486_v57  ;;  %v488_v62 = vld [vmem:[%s2048_s30 + $0xaf8] sm:$0xff] }
  0xe7   : > { %1505 = vst [vmem:[%s2063_s17 + $0xac0] sm:$0xff] %v993_v49  ;;  %v999_v61 = vmul.f32 2.5, %v487_v58  ;;  %v489_v63 = vld [vmem:[%s2048_s30 + $0xb00] sm:$0xff]  ;;  %v490_v0 = vld [vmem:[%s2048_s30 + $0xb08] sm:$0xff]  ;;  %1506 = vst [vmem:[%s2063_s17 + $0xac8] sm:$0xff] %v994_v53  ;;  %v1000_v1 = vmul.f32 2.5, %v488_v62 }
  0xe8   : > { %1507 = vst [vmem:[%s2063_s17 + $0xad0] sm:$0xff] %v995_v54  ;;  %1508 = vst [vmem:[%s2063_s17 + $0xad8] sm:$0xff] %v996_v55  ;;  %v1001_v2 = vmul.f32 2.5, %v489_v63  ;;  %v1002_v3 = vmul.f32 2.5, %v490_v0  ;;  %v491_v4 = vld [vmem:[%s2048_s30 + $0xb10] sm:$0xff]  ;;  %v492_v5 = vld [vmem:[%s2048_s30 + $0xb18] sm:$0xff] }
  0xe9   : > { %v493_v6 = vld [vmem:[%s2048_s30 + $0xb20] sm:$0xff]  ;;  %1509 = vst [vmem:[%s2063_s17 + $0xae0] sm:$0xff] %v997_v59  ;;  %1510 = vst [vmem:[%s2063_s17 + $0xae8] sm:$0xff] %v998_v60  ;;  %v1003_v7 = vmul.f32 2.5, %v491_v4  ;;  %v1004_v8 = vmul.f32 2.5, %v492_v5  ;;  %v494_v10 = vld [vmem:[%s2048_s30 + $0xb28] sm:$0xff] }
  0xea   : > { %1511 = vst [vmem:[%s2063_s17 + $0xaf0] sm:$0xff] %v999_v61  ;;  %v1005_v9 = vmul.f32 2.5, %v493_v6  ;;  %v495_v11 = vld [vmem:[%s2048_s30 + $0xb30] sm:$0xff]  ;;  %v496_v12 = vld [vmem:[%s2048_s30 + $0xb38] sm:$0xff]  ;;  %1512 = vst [vmem:[%s2063_s17 + $0xaf8] sm:$0xff] %v1000_v1  ;;  %v1006_v13 = vmul.f32 2.5, %v494_v10 }
  0xeb   : > { %1513 = vst [vmem:[%s2063_s17 + $0xb00] sm:$0xff] %v1001_v2  ;;  %1514 = vst [vmem:[%s2063_s17 + $0xb08] sm:$0xff] %v1002_v3  ;;  %v1007_v14 = vmul.f32 2.5, %v495_v11  ;;  %v1008_v15 = vmul.f32 2.5, %v496_v12  ;;  %v497_v16 = vld [vmem:[%s2048_s30 + $0xb40] sm:$0xff]  ;;  %v498_v17 = vld [vmem:[%s2048_s30 + $0xb48] sm:$0xff] }
  0xec   : > { %v499_v18 = vld [vmem:[%s2048_s30 + $0xb50] sm:$0xff]  ;;  %1515 = vst [vmem:[%s2063_s17 + $0xb10] sm:$0xff] %v1003_v7  ;;  %1516 = vst [vmem:[%s2063_s17 + $0xb18] sm:$0xff] %v1004_v8  ;;  %v1009_v19 = vmul.f32 2.5, %v497_v16  ;;  %v1010_v20 = vmul.f32 2.5, %v498_v17  ;;  %v500_v22 = vld [vmem:[%s2048_s30 + $0xb58] sm:$0xff] }
  0xed   : > { %1517 = vst [vmem:[%s2063_s17 + $0xb20] sm:$0xff] %v1005_v9  ;;  %v1011_v21 = vmul.f32 2.5, %v499_v18  ;;  %v501_v23 = vld [vmem:[%s2048_s30 + $0xb60] sm:$0xff]  ;;  %v502_v24 = vld [vmem:[%s2048_s30 + $0xb68] sm:$0xff]  ;;  %1518 = vst [vmem:[%s2063_s17 + $0xb28] sm:$0xff] %v1006_v13  ;;  %v1012_v25 = vmul.f32 2.5, %v500_v22 }
  0xee   : > { %1519 = vst [vmem:[%s2063_s17 + $0xb30] sm:$0xff] %v1007_v14  ;;  %1520 = vst [vmem:[%s2063_s17 + $0xb38] sm:$0xff] %v1008_v15  ;;  %v1013_v26 = vmul.f32 2.5, %v501_v23  ;;  %v1014_v27 = vmul.f32 2.5, %v502_v24  ;;  %v503_v28 = vld [vmem:[%s2048_s30 + $0xb70] sm:$0xff]  ;;  %v504_v29 = vld [vmem:[%s2048_s30 + $0xb78] sm:$0xff] }
  0xef   : > { %v505_v30 = vld [vmem:[%s2048_s30 + $0xb80] sm:$0xff]  ;;  %1521 = vst [vmem:[%s2063_s17 + $0xb40] sm:$0xff] %v1009_v19  ;;  %1522 = vst [vmem:[%s2063_s17 + $0xb48] sm:$0xff] %v1010_v20  ;;  %v1015_v31 = vmul.f32 2.5, %v503_v28  ;;  %v1016_v32 = vmul.f32 2.5, %v504_v29  ;;  %v506_v34 = vld [vmem:[%s2048_s30 + $0xb88] sm:$0xff] }
  0xf0   : > { %1523 = vst [vmem:[%s2063_s17 + $0xb50] sm:$0xff] %v1011_v21  ;;  %v1017_v33 = vmul.f32 2.5, %v505_v30  ;;  %v507_v35 = vld [vmem:[%s2048_s30 + $0xb90] sm:$0xff]  ;;  %v508_v36 = vld [vmem:[%s2048_s30 + $0xb98] sm:$0xff]  ;;  %1524 = vst [vmem:[%s2063_s17 + $0xb58] sm:$0xff] %v1012_v25  ;;  %v1018_v37 = vmul.f32 2.5, %v506_v34 }
  0xf1   : > { %1525 = vst [vmem:[%s2063_s17 + $0xb60] sm:$0xff] %v1013_v26  ;;  %1526 = vst [vmem:[%s2063_s17 + $0xb68] sm:$0xff] %v1014_v27  ;;  %v1019_v38 = vmul.f32 2.5, %v507_v35  ;;  %v1020_v39 = vmul.f32 2.5, %v508_v36  ;;  %v509_v40 = vld [vmem:[%s2048_s30 + $0xba0] sm:$0xff]  ;;  %v510_v41 = vld [vmem:[%s2048_s30 + $0xba8] sm:$0xff] }
  0xf2   : > { %v511_v42 = vld [vmem:[%s2048_s30 + $0xbb0] sm:$0xff]  ;;  %1527 = vst [vmem:[%s2063_s17 + $0xb70] sm:$0xff] %v1015_v31  ;;  %1528 = vst [vmem:[%s2063_s17 + $0xb78] sm:$0xff] %v1016_v32  ;;  %v1021_v43 = vmul.f32 2.5, %v509_v40  ;;  %v1022_v44 = vmul.f32 2.5, %v510_v41  ;;  %v512_v46 = vld [vmem:[%s2048_s30 + $0xbb8] sm:$0xff] }
  0xf3   : > { %1529 = vst [vmem:[%s2063_s17 + $0xb80] sm:$0xff] %v1017_v33  ;;  %v1023_v45 = vmul.f32 2.5, %v511_v42  ;;  %v513_v47 = vld [vmem:[%s2048_s30 + $0xbc0] sm:$0xff]  ;;  %v514_v48 = vld [vmem:[%s2048_s30 + $0xbc8] sm:$0xff]  ;;  %1530 = vst [vmem:[%s2063_s17 + $0xb88] sm:$0xff] %v1018_v37  ;;  %v1024_v49 = vmul.f32 2.5, %v512_v46 }
  0xf4   : > { %1531 = vst [vmem:[%s2063_s17 + $0xb90] sm:$0xff] %v1019_v38  ;;  %1532 = vst [vmem:[%s2063_s17 + $0xb98] sm:$0xff] %v1020_v39  ;;  %v1025_v50 = vmul.f32 2.5, %v513_v47  ;;  %v1026_v51 = vmul.f32 2.5, %v514_v48  ;;  %v515_v52 = vld [vmem:[%s2048_s30 + $0xbd0] sm:$0xff]  ;;  %v516_v53 = vld [vmem:[%s2048_s30 + $0xbd8] sm:$0xff] }
  0xf5   : > { %v517_v54 = vld [vmem:[%s2048_s30 + $0xbe0] sm:$0xff]  ;;  %1533 = vst [vmem:[%s2063_s17 + $0xba0] sm:$0xff] %v1021_v43  ;;  %1534 = vst [vmem:[%s2063_s17 + $0xba8] sm:$0xff] %v1022_v44  ;;  %v1027_v55 = vmul.f32 2.5, %v515_v52  ;;  %v1028_v56 = vmul.f32 2.5, %v516_v53  ;;  %v518_v58 = vld [vmem:[%s2048_s30 + $0xbe8] sm:$0xff] }
  0xf6   : > { %1535 = vst [vmem:[%s2063_s17 + $0xbb0] sm:$0xff] %v1023_v45  ;;  %v1029_v57 = vmul.f32 2.5, %v517_v54  ;;  %v519_v59 = vld [vmem:[%s2048_s30 + $0xbf0] sm:$0xff]  ;;  %v520_v60 = vld [vmem:[%s2048_s30 + $0xbf8] sm:$0xff]  ;;  %1536 = vst [vmem:[%s2063_s17 + $0xbb8] sm:$0xff] %v1024_v49  ;;  %v1030_v61 = vmul.f32 2.5, %v518_v58 }
  0xf7   : > { %1537 = vst [vmem:[%s2063_s17 + $0xbc0] sm:$0xff] %v1025_v50  ;;  %1538 = vst [vmem:[%s2063_s17 + $0xbc8] sm:$0xff] %v1026_v51  ;;  %v1031_v62 = vmul.f32 2.5, %v519_v59  ;;  %v1032_v63 = vmul.f32 2.5, %v520_v60  ;;  %v521_v0 = vld [vmem:[%s2048_s30 + $0xc00] sm:$0xff]  ;;  %v522_v1 = vld [vmem:[%s2048_s30 + $0xc08] sm:$0xff] }
  0xf8   : > { %v523_v2 = vld [vmem:[%s2048_s30 + $0xc10] sm:$0xff]  ;;  %1539 = vst [vmem:[%s2063_s17 + $0xbd0] sm:$0xff] %v1027_v55  ;;  %1540 = vst [vmem:[%s2063_s17 + $0xbd8] sm:$0xff] %v1028_v56  ;;  %v1033_v3 = vmul.f32 2.5, %v521_v0  ;;  %v1034_v4 = vmul.f32 2.5, %v522_v1  ;;  %v524_v6 = vld [vmem:[%s2048_s30 + $0xc18] sm:$0xff] }
  0xf9   : > { %1541 = vst [vmem:[%s2063_s17 + $0xbe0] sm:$0xff] %v1029_v57  ;;  %v1035_v5 = vmul.f32 2.5, %v523_v2  ;;  %v525_v7 = vld [vmem:[%s2048_s30 + $0xc20] sm:$0xff]  ;;  %v526_v8 = vld [vmem:[%s2048_s30 + $0xc28] sm:$0xff]  ;;  %1542 = vst [vmem:[%s2063_s17 + $0xbe8] sm:$0xff] %v1030_v61  ;;  %v1036_v9 = vmul.f32 2.5, %v524_v6 }
  0xfa   : > { %1543 = vst [vmem:[%s2063_s17 + $0xbf0] sm:$0xff] %v1031_v62  ;;  %1544 = vst [vmem:[%s2063_s17 + $0xbf8] sm:$0xff] %v1032_v63  ;;  %v1037_v10 = vmul.f32 2.5, %v525_v7  ;;  %v1038_v11 = vmul.f32 2.5, %v526_v8  ;;  %v527_v12 = vld [vmem:[%s2048_s30 + $0xc30] sm:$0xff]  ;;  %v528_v13 = vld [vmem:[%s2048_s30 + $0xc38] sm:$0xff] }
  0xfb   : > { %v529_v14 = vld [vmem:[%s2048_s30 + $0xc40] sm:$0xff]  ;;  %1545 = vst [vmem:[%s2063_s17 + $0xc00] sm:$0xff] %v1033_v3  ;;  %1546 = vst [vmem:[%s2063_s17 + $0xc08] sm:$0xff] %v1034_v4  ;;  %v1039_v15 = vmul.f32 2.5, %v527_v12  ;;  %v1040_v16 = vmul.f32 2.5, %v528_v13  ;;  %v530_v18 = vld [vmem:[%s2048_s30 + $0xc48] sm:$0xff] }
  0xfc   : > { %1547 = vst [vmem:[%s2063_s17 + $0xc10] sm:$0xff] %v1035_v5  ;;  %v1041_v17 = vmul.f32 2.5, %v529_v14  ;;  %v531_v19 = vld [vmem:[%s2048_s30 + $0xc50] sm:$0xff]  ;;  %v532_v20 = vld [vmem:[%s2048_s30 + $0xc58] sm:$0xff]  ;;  %1548 = vst [vmem:[%s2063_s17 + $0xc18] sm:$0xff] %v1036_v9  ;;  %v1042_v21 = vmul.f32 2.5, %v530_v18 }
  0xfd   : > { %1549 = vst [vmem:[%s2063_s17 + $0xc20] sm:$0xff] %v1037_v10  ;;  %1550 = vst [vmem:[%s2063_s17 + $0xc28] sm:$0xff] %v1038_v11  ;;  %v1043_v22 = vmul.f32 2.5, %v531_v19  ;;  %v1044_v23 = vmul.f32 2.5, %v532_v20  ;;  %v533_v24 = vld [vmem:[%s2048_s30 + $0xc60] sm:$0xff]  ;;  %v534_v25 = vld [vmem:[%s2048_s30 + $0xc68] sm:$0xff] }
  0xfe   : > { %v535_v26 = vld [vmem:[%s2048_s30 + $0xc70] sm:$0xff]  ;;  %1551 = vst [vmem:[%s2063_s17 + $0xc30] sm:$0xff] %v1039_v15  ;;  %1552 = vst [vmem:[%s2063_s17 + $0xc38] sm:$0xff] %v1040_v16  ;;  %v1045_v27 = vmul.f32 2.5, %v533_v24  ;;  %v1046_v28 = vmul.f32 2.5, %v534_v25  ;;  %v536_v30 = vld [vmem:[%s2048_s30 + $0xc78] sm:$0xff] }
  0xff   : > { %1553 = vst [vmem:[%s2063_s17 + $0xc40] sm:$0xff] %v1041_v17  ;;  %v1047_v29 = vmul.f32 2.5, %v535_v26  ;;  %v537_v31 = vld [vmem:[%s2048_s30 + $0xc80] sm:$0xff]  ;;  %v538_v32 = vld [vmem:[%s2048_s30 + $0xc88] sm:$0xff]  ;;  %1554 = vst [vmem:[%s2063_s17 + $0xc48] sm:$0xff] %v1042_v21  ;;  %v1048_v33 = vmul.f32 2.5, %v536_v30 }
 0x100   : > { %1555 = vst [vmem:[%s2063_s17 + $0xc50] sm:$0xff] %v1043_v22  ;;  %1556 = vst [vmem:[%s2063_s17 + $0xc58] sm:$0xff] %v1044_v23  ;;  %v1049_v34 = vmul.f32 2.5, %v537_v31  ;;  %v1050_v35 = vmul.f32 2.5, %v538_v32  ;;  %v539_v36 = vld [vmem:[%s2048_s30 + $0xc90] sm:$0xff]  ;;  %v540_v37 = vld [vmem:[%s2048_s30 + $0xc98] sm:$0xff] }
 0x101   : > { %v541_v38 = vld [vmem:[%s2048_s30 + $0xca0] sm:$0xff]  ;;  %1557 = vst [vmem:[%s2063_s17 + $0xc60] sm:$0xff] %v1045_v27  ;;  %1558 = vst [vmem:[%s2063_s17 + $0xc68] sm:$0xff] %v1046_v28  ;;  %v1051_v39 = vmul.f32 2.5, %v539_v36  ;;  %v1052_v40 = vmul.f32 2.5, %v540_v37  ;;  %v542_v42 = vld [vmem:[%s2048_s30 + $0xca8] sm:$0xff] }
 0x102   : > { %1559 = vst [vmem:[%s2063_s17 + $0xc70] sm:$0xff] %v1047_v29  ;;  %v1053_v41 = vmul.f32 2.5, %v541_v38  ;;  %v543_v43 = vld [vmem:[%s2048_s30 + $0xcb0] sm:$0xff]  ;;  %v544_v44 = vld [vmem:[%s2048_s30 + $0xcb8] sm:$0xff]  ;;  %1560 = vst [vmem:[%s2063_s17 + $0xc78] sm:$0xff] %v1048_v33  ;;  %v1054_v45 = vmul.f32 2.5, %v542_v42 }
 0x103   : > { %1561 = vst [vmem:[%s2063_s17 + $0xc80] sm:$0xff] %v1049_v34  ;;  %1562 = vst [vmem:[%s2063_s17 + $0xc88] sm:$0xff] %v1050_v35  ;;  %v1055_v46 = vmul.f32 2.5, %v543_v43  ;;  %v1056_v47 = vmul.f32 2.5, %v544_v44  ;;  %v545_v48 = vld [vmem:[%s2048_s30 + $0xcc0] sm:$0xff]  ;;  %v546_v49 = vld [vmem:[%s2048_s30 + $0xcc8] sm:$0xff] }
 0x104   : > { %v547_v50 = vld [vmem:[%s2048_s30 + $0xcd0] sm:$0xff]  ;;  %1563 = vst [vmem:[%s2063_s17 + $0xc90] sm:$0xff] %v1051_v39  ;;  %1564 = vst [vmem:[%s2063_s17 + $0xc98] sm:$0xff] %v1052_v40  ;;  %v1057_v51 = vmul.f32 2.5, %v545_v48  ;;  %v1058_v52 = vmul.f32 2.5, %v546_v49  ;;  %v548_v54 = vld [vmem:[%s2048_s30 + $0xcd8] sm:$0xff] }
 0x105   : > { %1565 = vst [vmem:[%s2063_s17 + $0xca0] sm:$0xff] %v1053_v41  ;;  %v1059_v53 = vmul.f32 2.5, %v547_v50  ;;  %v549_v55 = vld [vmem:[%s2048_s30 + $0xce0] sm:$0xff]  ;;  %v550_v56 = vld [vmem:[%s2048_s30 + $0xce8] sm:$0xff]  ;;  %1566 = vst [vmem:[%s2063_s17 + $0xca8] sm:$0xff] %v1054_v45  ;;  %v1060_v57 = vmul.f32 2.5, %v548_v54 }
 0x106   : > { %1567 = vst [vmem:[%s2063_s17 + $0xcb0] sm:$0xff] %v1055_v46  ;;  %1568 = vst [vmem:[%s2063_s17 + $0xcb8] sm:$0xff] %v1056_v47  ;;  %v1061_v58 = vmul.f32 2.5, %v549_v55  ;;  %v1062_v59 = vmul.f32 2.5, %v550_v56  ;;  %v551_v60 = vld [vmem:[%s2048_s30 + $0xcf0] sm:$0xff]  ;;  %v552_v61 = vld [vmem:[%s2048_s30 + $0xcf8] sm:$0xff] }
 0x107   : > { %v553_v62 = vld [vmem:[%s2048_s30 + $0xd00] sm:$0xff]  ;;  %1569 = vst [vmem:[%s2063_s17 + $0xcc0] sm:$0xff] %v1057_v51  ;;  %1570 = vst [vmem:[%s2063_s17 + $0xcc8] sm:$0xff] %v1058_v52  ;;  %v1063_v63 = vmul.f32 2.5, %v551_v60  ;;  %v1064_v0 = vmul.f32 2.5, %v552_v61  ;;  %v554_v2 = vld [vmem:[%s2048_s30 + $0xd08] sm:$0xff] }
 0x108   : > { %1571 = vst [vmem:[%s2063_s17 + $0xcd0] sm:$0xff] %v1059_v53  ;;  %v1065_v1 = vmul.f32 2.5, %v553_v62  ;;  %v555_v3 = vld [vmem:[%s2048_s30 + $0xd10] sm:$0xff]  ;;  %v556_v4 = vld [vmem:[%s2048_s30 + $0xd18] sm:$0xff]  ;;  %1572 = vst [vmem:[%s2063_s17 + $0xcd8] sm:$0xff] %v1060_v57  ;;  %v1066_v5 = vmul.f32 2.5, %v554_v2 }
 0x109   : > { %1573 = vst [vmem:[%s2063_s17 + $0xce0] sm:$0xff] %v1061_v58  ;;  %1574 = vst [vmem:[%s2063_s17 + $0xce8] sm:$0xff] %v1062_v59  ;;  %v1067_v6 = vmul.f32 2.5, %v555_v3  ;;  %v1068_v7 = vmul.f32 2.5, %v556_v4  ;;  %v557_v8 = vld [vmem:[%s2048_s30 + $0xd20] sm:$0xff]  ;;  %v558_v9 = vld [vmem:[%s2048_s30 + $0xd28] sm:$0xff] }
 0x10a   : > { %v559_v10 = vld [vmem:[%s2048_s30 + $0xd30] sm:$0xff]  ;;  %1575 = vst [vmem:[%s2063_s17 + $0xcf0] sm:$0xff] %v1063_v63  ;;  %1576 = vst [vmem:[%s2063_s17 + $0xcf8] sm:$0xff] %v1064_v0  ;;  %v1069_v11 = vmul.f32 2.5, %v557_v8  ;;  %v1070_v12 = vmul.f32 2.5, %v558_v9  ;;  %v560_v14 = vld [vmem:[%s2048_s30 + $0xd38] sm:$0xff] }
 0x10b   : > { %1577 = vst [vmem:[%s2063_s17 + $0xd00] sm:$0xff] %v1065_v1  ;;  %v1071_v13 = vmul.f32 2.5, %v559_v10  ;;  %v561_v15 = vld [vmem:[%s2048_s30 + $0xd40] sm:$0xff]  ;;  %v562_v16 = vld [vmem:[%s2048_s30 + $0xd48] sm:$0xff]  ;;  %1578 = vst [vmem:[%s2063_s17 + $0xd08] sm:$0xff] %v1066_v5  ;;  %v1072_v17 = vmul.f32 2.5, %v560_v14 }
 0x10c   : > { %1579 = vst [vmem:[%s2063_s17 + $0xd10] sm:$0xff] %v1067_v6  ;;  %1580 = vst [vmem:[%s2063_s17 + $0xd18] sm:$0xff] %v1068_v7  ;;  %v1073_v18 = vmul.f32 2.5, %v561_v15  ;;  %v1074_v19 = vmul.f32 2.5, %v562_v16  ;;  %v563_v20 = vld [vmem:[%s2048_s30 + $0xd50] sm:$0xff]  ;;  %v564_v21 = vld [vmem:[%s2048_s30 + $0xd58] sm:$0xff] }
 0x10d   : > { %v565_v22 = vld [vmem:[%s2048_s30 + $0xd60] sm:$0xff]  ;;  %1581 = vst [vmem:[%s2063_s17 + $0xd20] sm:$0xff] %v1069_v11  ;;  %1582 = vst [vmem:[%s2063_s17 + $0xd28] sm:$0xff] %v1070_v12  ;;  %v1075_v23 = vmul.f32 2.5, %v563_v20  ;;  %v1076_v24 = vmul.f32 2.5, %v564_v21  ;;  %v566_v26 = vld [vmem:[%s2048_s30 + $0xd68] sm:$0xff] }
 0x10e   : > { %1583 = vst [vmem:[%s2063_s17 + $0xd30] sm:$0xff] %v1071_v13  ;;  %v1077_v25 = vmul.f32 2.5, %v565_v22  ;;  %v567_v27 = vld [vmem:[%s2048_s30 + $0xd70] sm:$0xff]  ;;  %v568_v28 = vld [vmem:[%s2048_s30 + $0xd78] sm:$0xff]  ;;  %1584 = vst [vmem:[%s2063_s17 + $0xd38] sm:$0xff] %v1072_v17  ;;  %v1078_v29 = vmul.f32 2.5, %v566_v26 }
 0x10f   : > { %1585 = vst [vmem:[%s2063_s17 + $0xd40] sm:$0xff] %v1073_v18  ;;  %1586 = vst [vmem:[%s2063_s17 + $0xd48] sm:$0xff] %v1074_v19  ;;  %v1079_v30 = vmul.f32 2.5, %v567_v27  ;;  %v1080_v31 = vmul.f32 2.5, %v568_v28  ;;  %v569_v32 = vld [vmem:[%s2048_s30 + $0xd80] sm:$0xff]  ;;  %v570_v33 = vld [vmem:[%s2048_s30 + $0xd88] sm:$0xff] }
 0x110   : > { %v571_v34 = vld [vmem:[%s2048_s30 + $0xd90] sm:$0xff]  ;;  %1587 = vst [vmem:[%s2063_s17 + $0xd50] sm:$0xff] %v1075_v23  ;;  %1588 = vst [vmem:[%s2063_s17 + $0xd58] sm:$0xff] %v1076_v24  ;;  %v1081_v35 = vmul.f32 2.5, %v569_v32  ;;  %v1082_v36 = vmul.f32 2.5, %v570_v33  ;;  %v572_v38 = vld [vmem:[%s2048_s30 + $0xd98] sm:$0xff] }
 0x111   : > { %1589 = vst [vmem:[%s2063_s17 + $0xd60] sm:$0xff] %v1077_v25  ;;  %v1083_v37 = vmul.f32 2.5, %v571_v34  ;;  %v573_v39 = vld [vmem:[%s2048_s30 + $0xda0] sm:$0xff]  ;;  %v574_v40 = vld [vmem:[%s2048_s30 + $0xda8] sm:$0xff]  ;;  %1590 = vst [vmem:[%s2063_s17 + $0xd68] sm:$0xff] %v1078_v29  ;;  %v1084_v41 = vmul.f32 2.5, %v572_v38 }
 0x112   : > { %1591 = vst [vmem:[%s2063_s17 + $0xd70] sm:$0xff] %v1079_v30  ;;  %1592 = vst [vmem:[%s2063_s17 + $0xd78] sm:$0xff] %v1080_v31  ;;  %v1085_v42 = vmul.f32 2.5, %v573_v39  ;;  %v1086_v43 = vmul.f32 2.5, %v574_v40  ;;  %v575_v44 = vld [vmem:[%s2048_s30 + $0xdb0] sm:$0xff]  ;;  %v576_v45 = vld [vmem:[%s2048_s30 + $0xdb8] sm:$0xff] }
 0x113   : > { %v577_v46 = vld [vmem:[%s2048_s30 + $0xdc0] sm:$0xff]  ;;  %1593 = vst [vmem:[%s2063_s17 + $0xd80] sm:$0xff] %v1081_v35  ;;  %1594 = vst [vmem:[%s2063_s17 + $0xd88] sm:$0xff] %v1082_v36  ;;  %v1087_v47 = vmul.f32 2.5, %v575_v44  ;;  %v1088_v48 = vmul.f32 2.5, %v576_v45  ;;  %v578_v50 = vld [vmem:[%s2048_s30 + $0xdc8] sm:$0xff] }
 0x114   : > { %1595 = vst [vmem:[%s2063_s17 + $0xd90] sm:$0xff] %v1083_v37  ;;  %v1089_v49 = vmul.f32 2.5, %v577_v46  ;;  %v579_v51 = vld [vmem:[%s2048_s30 + $0xdd0] sm:$0xff]  ;;  %v580_v52 = vld [vmem:[%s2048_s30 + $0xdd8] sm:$0xff]  ;;  %1596 = vst [vmem:[%s2063_s17 + $0xd98] sm:$0xff] %v1084_v41  ;;  %v1090_v53 = vmul.f32 2.5, %v578_v50 }
 0x115   : > { %1597 = vst [vmem:[%s2063_s17 + $0xda0] sm:$0xff] %v1085_v42  ;;  %1598 = vst [vmem:[%s2063_s17 + $0xda8] sm:$0xff] %v1086_v43  ;;  %v1091_v54 = vmul.f32 2.5, %v579_v51  ;;  %v1092_v55 = vmul.f32 2.5, %v580_v52  ;;  %v581_v56 = vld [vmem:[%s2048_s30 + $0xde0] sm:$0xff]  ;;  %v582_v57 = vld [vmem:[%s2048_s30 + $0xde8] sm:$0xff] }
 0x116   : > { %v583_v58 = vld [vmem:[%s2048_s30 + $0xdf0] sm:$0xff]  ;;  %1599 = vst [vmem:[%s2063_s17 + $0xdb0] sm:$0xff] %v1087_v47  ;;  %1600 = vst [vmem:[%s2063_s17 + $0xdb8] sm:$0xff] %v1088_v48  ;;  %v1093_v59 = vmul.f32 2.5, %v581_v56  ;;  %v1094_v60 = vmul.f32 2.5, %v582_v57  ;;  %v584_v62 = vld [vmem:[%s2048_s30 + $0xdf8] sm:$0xff] }
 0x117   : > { %1601 = vst [vmem:[%s2063_s17 + $0xdc0] sm:$0xff] %v1089_v49  ;;  %v1095_v61 = vmul.f32 2.5, %v583_v58  ;;  %v585_v63 = vld [vmem:[%s2048_s30 + $0xe00] sm:$0xff]  ;;  %v586_v0 = vld [vmem:[%s2048_s30 + $0xe08] sm:$0xff]  ;;  %1602 = vst [vmem:[%s2063_s17 + $0xdc8] sm:$0xff] %v1090_v53  ;;  %v1096_v1 = vmul.f32 2.5, %v584_v62 }
 0x118   : > { %1603 = vst [vmem:[%s2063_s17 + $0xdd0] sm:$0xff] %v1091_v54  ;;  %1604 = vst [vmem:[%s2063_s17 + $0xdd8] sm:$0xff] %v1092_v55  ;;  %v1097_v2 = vmul.f32 2.5, %v585_v63  ;;  %v1098_v3 = vmul.f32 2.5, %v586_v0  ;;  %v587_v4 = vld [vmem:[%s2048_s30 + $0xe10] sm:$0xff]  ;;  %v588_v5 = vld [vmem:[%s2048_s30 + $0xe18] sm:$0xff] }
 0x119   : > { %v589_v6 = vld [vmem:[%s2048_s30 + $0xe20] sm:$0xff]  ;;  %1605 = vst [vmem:[%s2063_s17 + $0xde0] sm:$0xff] %v1093_v59  ;;  %1606 = vst [vmem:[%s2063_s17 + $0xde8] sm:$0xff] %v1094_v60  ;;  %v1099_v7 = vmul.f32 2.5, %v587_v4  ;;  %v1100_v8 = vmul.f32 2.5, %v588_v5  ;;  %v590_v10 = vld [vmem:[%s2048_s30 + $0xe28] sm:$0xff] }
 0x11a   : > { %1607 = vst [vmem:[%s2063_s17 + $0xdf0] sm:$0xff] %v1095_v61  ;;  %v1101_v9 = vmul.f32 2.5, %v589_v6  ;;  %v591_v11 = vld [vmem:[%s2048_s30 + $0xe30] sm:$0xff]  ;;  %v592_v12 = vld [vmem:[%s2048_s30 + $0xe38] sm:$0xff]  ;;  %1608 = vst [vmem:[%s2063_s17 + $0xdf8] sm:$0xff] %v1096_v1  ;;  %v1102_v13 = vmul.f32 2.5, %v590_v10 }
 0x11b   : > { %1609 = vst [vmem:[%s2063_s17 + $0xe00] sm:$0xff] %v1097_v2  ;;  %1610 = vst [vmem:[%s2063_s17 + $0xe08] sm:$0xff] %v1098_v3  ;;  %v1103_v14 = vmul.f32 2.5, %v591_v11  ;;  %v1104_v15 = vmul.f32 2.5, %v592_v12  ;;  %v593_v16 = vld [vmem:[%s2048_s30 + $0xe40] sm:$0xff]  ;;  %v594_v17 = vld [vmem:[%s2048_s30 + $0xe48] sm:$0xff] }
 0x11c   : > { %v595_v18 = vld [vmem:[%s2048_s30 + $0xe50] sm:$0xff]  ;;  %1611 = vst [vmem:[%s2063_s17 + $0xe10] sm:$0xff] %v1099_v7  ;;  %1612 = vst [vmem:[%s2063_s17 + $0xe18] sm:$0xff] %v1100_v8  ;;  %v1105_v19 = vmul.f32 2.5, %v593_v16  ;;  %v1106_v20 = vmul.f32 2.5, %v594_v17  ;;  %v596_v22 = vld [vmem:[%s2048_s30 + $0xe58] sm:$0xff] }
 0x11d   : > { %1613 = vst [vmem:[%s2063_s17 + $0xe20] sm:$0xff] %v1101_v9  ;;  %v1107_v21 = vmul.f32 2.5, %v595_v18  ;;  %v597_v23 = vld [vmem:[%s2048_s30 + $0xe60] sm:$0xff]  ;;  %v598_v24 = vld [vmem:[%s2048_s30 + $0xe68] sm:$0xff]  ;;  %1614 = vst [vmem:[%s2063_s17 + $0xe28] sm:$0xff] %v1102_v13  ;;  %v1108_v25 = vmul.f32 2.5, %v596_v22 }
 0x11e   : > { %1615 = vst [vmem:[%s2063_s17 + $0xe30] sm:$0xff] %v1103_v14  ;;  %1616 = vst [vmem:[%s2063_s17 + $0xe38] sm:$0xff] %v1104_v15  ;;  %v1109_v26 = vmul.f32 2.5, %v597_v23  ;;  %v1110_v27 = vmul.f32 2.5, %v598_v24  ;;  %v599_v28 = vld [vmem:[%s2048_s30 + $0xe70] sm:$0xff]  ;;  %v600_v29 = vld [vmem:[%s2048_s30 + $0xe78] sm:$0xff] }
 0x11f   : > { %v601_v30 = vld [vmem:[%s2048_s30 + $0xe80] sm:$0xff]  ;;  %1617 = vst [vmem:[%s2063_s17 + $0xe40] sm:$0xff] %v1105_v19  ;;  %1618 = vst [vmem:[%s2063_s17 + $0xe48] sm:$0xff] %v1106_v20  ;;  %v1111_v31 = vmul.f32 2.5, %v599_v28  ;;  %v1112_v32 = vmul.f32 2.5, %v600_v29  ;;  %v602_v34 = vld [vmem:[%s2048_s30 + $0xe88] sm:$0xff] }
 0x120   : > { %1619 = vst [vmem:[%s2063_s17 + $0xe50] sm:$0xff] %v1107_v21  ;;  %v1113_v33 = vmul.f32 2.5, %v601_v30  ;;  %v603_v35 = vld [vmem:[%s2048_s30 + $0xe90] sm:$0xff]  ;;  %v604_v36 = vld [vmem:[%s2048_s30 + $0xe98] sm:$0xff]  ;;  %1620 = vst [vmem:[%s2063_s17 + $0xe58] sm:$0xff] %v1108_v25  ;;  %v1114_v37 = vmul.f32 2.5, %v602_v34 }
 0x121   : > { %1621 = vst [vmem:[%s2063_s17 + $0xe60] sm:$0xff] %v1109_v26  ;;  %1622 = vst [vmem:[%s2063_s17 + $0xe68] sm:$0xff] %v1110_v27  ;;  %v1115_v38 = vmul.f32 2.5, %v603_v35  ;;  %v1116_v39 = vmul.f32 2.5, %v604_v36  ;;  %v605_v40 = vld [vmem:[%s2048_s30 + $0xea0] sm:$0xff]  ;;  %v606_v41 = vld [vmem:[%s2048_s30 + $0xea8] sm:$0xff] }
 0x122   : > { %v607_v42 = vld [vmem:[%s2048_s30 + $0xeb0] sm:$0xff]  ;;  %1623 = vst [vmem:[%s2063_s17 + $0xe70] sm:$0xff] %v1111_v31  ;;  %1624 = vst [vmem:[%s2063_s17 + $0xe78] sm:$0xff] %v1112_v32  ;;  %v1117_v43 = vmul.f32 2.5, %v605_v40  ;;  %v1118_v44 = vmul.f32 2.5, %v606_v41  ;;  %v608_v46 = vld [vmem:[%s2048_s30 + $0xeb8] sm:$0xff] }
 0x123   : > { %1625 = vst [vmem:[%s2063_s17 + $0xe80] sm:$0xff] %v1113_v33  ;;  %v1119_v45 = vmul.f32 2.5, %v607_v42  ;;  %v609_v47 = vld [vmem:[%s2048_s30 + $0xec0] sm:$0xff]  ;;  %v610_v48 = vld [vmem:[%s2048_s30 + $0xec8] sm:$0xff]  ;;  %1626 = vst [vmem:[%s2063_s17 + $0xe88] sm:$0xff] %v1114_v37  ;;  %v1120_v49 = vmul.f32 2.5, %v608_v46 }
 0x124   : > { %1627 = vst [vmem:[%s2063_s17 + $0xe90] sm:$0xff] %v1115_v38  ;;  %1628 = vst [vmem:[%s2063_s17 + $0xe98] sm:$0xff] %v1116_v39  ;;  %v1121_v50 = vmul.f32 2.5, %v609_v47  ;;  %v1122_v51 = vmul.f32 2.5, %v610_v48  ;;  %v611_v52 = vld [vmem:[%s2048_s30 + $0xed0] sm:$0xff]  ;;  %v612_v53 = vld [vmem:[%s2048_s30 + $0xed8] sm:$0xff] }
 0x125   : > { %v613_v54 = vld [vmem:[%s2048_s30 + $0xee0] sm:$0xff]  ;;  %1629 = vst [vmem:[%s2063_s17 + $0xea0] sm:$0xff] %v1117_v43  ;;  %1630 = vst [vmem:[%s2063_s17 + $0xea8] sm:$0xff] %v1118_v44  ;;  %v1123_v55 = vmul.f32 2.5, %v611_v52  ;;  %v1124_v56 = vmul.f32 2.5, %v612_v53  ;;  %v614_v58 = vld [vmem:[%s2048_s30 + $0xee8] sm:$0xff] }
 0x126   : > { %1631 = vst [vmem:[%s2063_s17 + $0xeb0] sm:$0xff] %v1119_v45  ;;  %v1125_v57 = vmul.f32 2.5, %v613_v54  ;;  %v615_v59 = vld [vmem:[%s2048_s30 + $0xef0] sm:$0xff]  ;;  %v616_v60 = vld [vmem:[%s2048_s30 + $0xef8] sm:$0xff]  ;;  %1632 = vst [vmem:[%s2063_s17 + $0xeb8] sm:$0xff] %v1120_v49  ;;  %v1126_v61 = vmul.f32 2.5, %v614_v58 }
 0x127   : > { %1633 = vst [vmem:[%s2063_s17 + $0xec0] sm:$0xff] %v1121_v50  ;;  %1634 = vst [vmem:[%s2063_s17 + $0xec8] sm:$0xff] %v1122_v51  ;;  %v1127_v62 = vmul.f32 2.5, %v615_v59  ;;  %v1128_v63 = vmul.f32 2.5, %v616_v60  ;;  %v617_v0 = vld [vmem:[%s2048_s30 + $0xf00] sm:$0xff]  ;;  %v618_v1 = vld [vmem:[%s2048_s30 + $0xf08] sm:$0xff] }
 0x128   : > { %v619_v2 = vld [vmem:[%s2048_s30 + $0xf10] sm:$0xff]  ;;  %1635 = vst [vmem:[%s2063_s17 + $0xed0] sm:$0xff] %v1123_v55  ;;  %1636 = vst [vmem:[%s2063_s17 + $0xed8] sm:$0xff] %v1124_v56  ;;  %v1129_v3 = vmul.f32 2.5, %v617_v0  ;;  %v1130_v4 = vmul.f32 2.5, %v618_v1  ;;  %v620_v6 = vld [vmem:[%s2048_s30 + $0xf18] sm:$0xff] }
 0x129   : > { %1637 = vst [vmem:[%s2063_s17 + $0xee0] sm:$0xff] %v1125_v57  ;;  %v1131_v5 = vmul.f32 2.5, %v619_v2  ;;  %v621_v7 = vld [vmem:[%s2048_s30 + $0xf20] sm:$0xff]  ;;  %v622_v8 = vld [vmem:[%s2048_s30 + $0xf28] sm:$0xff]  ;;  %1638 = vst [vmem:[%s2063_s17 + $0xee8] sm:$0xff] %v1126_v61  ;;  %v1132_v9 = vmul.f32 2.5, %v620_v6 }
 0x12a   : > { %1639 = vst [vmem:[%s2063_s17 + $0xef0] sm:$0xff] %v1127_v62  ;;  %1640 = vst [vmem:[%s2063_s17 + $0xef8] sm:$0xff] %v1128_v63  ;;  %v1133_v10 = vmul.f32 2.5, %v621_v7  ;;  %v1134_v11 = vmul.f32 2.5, %v622_v8  ;;  %v623_v12 = vld [vmem:[%s2048_s30 + $0xf30] sm:$0xff]  ;;  %v624_v13 = vld [vmem:[%s2048_s30 + $0xf38] sm:$0xff] }
 0x12b   : > { %v625_v14 = vld [vmem:[%s2048_s30 + $0xf40] sm:$0xff]  ;;  %1641 = vst [vmem:[%s2063_s17 + $0xf00] sm:$0xff] %v1129_v3  ;;  %1642 = vst [vmem:[%s2063_s17 + $0xf08] sm:$0xff] %v1130_v4  ;;  %v1135_v15 = vmul.f32 2.5, %v623_v12  ;;  %v1136_v16 = vmul.f32 2.5, %v624_v13  ;;  %v626_v18 = vld [vmem:[%s2048_s30 + $0xf48] sm:$0xff] }
 0x12c   : > { %1643 = vst [vmem:[%s2063_s17 + $0xf10] sm:$0xff] %v1131_v5  ;;  %v1137_v17 = vmul.f32 2.5, %v625_v14  ;;  %v627_v19 = vld [vmem:[%s2048_s30 + $0xf50] sm:$0xff]  ;;  %v628_v20 = vld [vmem:[%s2048_s30 + $0xf58] sm:$0xff]  ;;  %1644 = vst [vmem:[%s2063_s17 + $0xf18] sm:$0xff] %v1132_v9  ;;  %v1138_v21 = vmul.f32 2.5, %v626_v18 }
 0x12d   : > { %1645 = vst [vmem:[%s2063_s17 + $0xf20] sm:$0xff] %v1133_v10  ;;  %1646 = vst [vmem:[%s2063_s17 + $0xf28] sm:$0xff] %v1134_v11  ;;  %v1139_v22 = vmul.f32 2.5, %v627_v19  ;;  %v1140_v23 = vmul.f32 2.5, %v628_v20  ;;  %v629_v24 = vld [vmem:[%s2048_s30 + $0xf60] sm:$0xff]  ;;  %v630_v25 = vld [vmem:[%s2048_s30 + $0xf68] sm:$0xff] }
 0x12e   : > { %v631_v26 = vld [vmem:[%s2048_s30 + $0xf70] sm:$0xff]  ;;  %1647 = vst [vmem:[%s2063_s17 + $0xf30] sm:$0xff] %v1135_v15  ;;  %1648 = vst [vmem:[%s2063_s17 + $0xf38] sm:$0xff] %v1136_v16  ;;  %v1141_v27 = vmul.f32 2.5, %v629_v24  ;;  %v1142_v28 = vmul.f32 2.5, %v630_v25  ;;  %v632_v30 = vld [vmem:[%s2048_s30 + $0xf78] sm:$0xff] }
 0x12f   : > { %1649 = vst [vmem:[%s2063_s17 + $0xf40] sm:$0xff] %v1137_v17  ;;  %v1143_v29 = vmul.f32 2.5, %v631_v26  ;;  %v633_v31 = vld [vmem:[%s2048_s30 + $0xf80] sm:$0xff]  ;;  %v634_v32 = vld [vmem:[%s2048_s30 + $0xf88] sm:$0xff]  ;;  %1650 = vst [vmem:[%s2063_s17 + $0xf48] sm:$0xff] %v1138_v21  ;;  %v1144_v33 = vmul.f32 2.5, %v632_v30 }
 0x130   : > { %1651 = vst [vmem:[%s2063_s17 + $0xf50] sm:$0xff] %v1139_v22  ;;  %1652 = vst [vmem:[%s2063_s17 + $0xf58] sm:$0xff] %v1140_v23  ;;  %v1145_v34 = vmul.f32 2.5, %v633_v31  ;;  %v1146_v35 = vmul.f32 2.5, %v634_v32  ;;  %v635_v36 = vld [vmem:[%s2048_s30 + $0xf90] sm:$0xff]  ;;  %v636_v37 = vld [vmem:[%s2048_s30 + $0xf98] sm:$0xff] }
 0x131   : > { %v637_v38 = vld [vmem:[%s2048_s30 + $0xfa0] sm:$0xff]  ;;  %1653 = vst [vmem:[%s2063_s17 + $0xf60] sm:$0xff] %v1141_v27  ;;  %1654 = vst [vmem:[%s2063_s17 + $0xf68] sm:$0xff] %v1142_v28  ;;  %v1147_v39 = vmul.f32 2.5, %v635_v36  ;;  %v1148_v40 = vmul.f32 2.5, %v636_v37  ;;  %v638_v42 = vld [vmem:[%s2048_s30 + $0xfa8] sm:$0xff] }
 0x132   : > { %1655 = vst [vmem:[%s2063_s17 + $0xf70] sm:$0xff] %v1143_v29  ;;  %v1149_v41 = vmul.f32 2.5, %v637_v38  ;;  %v639_v43 = vld [vmem:[%s2048_s30 + $0xfb0] sm:$0xff]  ;;  %v640_v44 = vld [vmem:[%s2048_s30 + $0xfb8] sm:$0xff]  ;;  %1656 = vst [vmem:[%s2063_s17 + $0xf78] sm:$0xff] %v1144_v33  ;;  %v1150_v45 = vmul.f32 2.5, %v638_v42 }
 0x133   : > { %1657 = vst [vmem:[%s2063_s17 + $0xf80] sm:$0xff] %v1145_v34  ;;  %1658 = vst [vmem:[%s2063_s17 + $0xf88] sm:$0xff] %v1146_v35  ;;  %v1151_v46 = vmul.f32 2.5, %v639_v43  ;;  %v1152_v47 = vmul.f32 2.5, %v640_v44  ;;  %v641_v48 = vld [vmem:[%s2048_s30 + $0xfc0] sm:$0xff]  ;;  %v642_v49 = vld [vmem:[%s2048_s30 + $0xfc8] sm:$0xff] }
 0x134   : > { %v643_v50 = vld [vmem:[%s2048_s30 + $0xfd0] sm:$0xff]  ;;  %1659 = vst [vmem:[%s2063_s17 + $0xf90] sm:$0xff] %v1147_v39  ;;  %1660 = vst [vmem:[%s2063_s17 + $0xf98] sm:$0xff] %v1148_v40  ;;  %v1153_v51 = vmul.f32 2.5, %v641_v48  ;;  %v1154_v52 = vmul.f32 2.5, %v642_v49  ;;  %v644_v54 = vld [vmem:[%s2048_s30 + $0xfd8] sm:$0xff] }
 0x135   : > { %1661 = vst [vmem:[%s2063_s17 + $0xfa0] sm:$0xff] %v1149_v41  ;;  %v1155_v53 = vmul.f32 2.5, %v643_v50  ;;  %v645_v55 = vld [vmem:[%s2048_s30 + $0xfe0] sm:$0xff]  ;;  %v646_v56 = vld [vmem:[%s2048_s30 + $0xfe8] sm:$0xff]  ;;  %1662 = vst [vmem:[%s2063_s17 + $0xfa8] sm:$0xff] %v1150_v45  ;;  %v1156_v57 = vmul.f32 2.5, %v644_v54 }
 0x136   : > { %1663 = vst [vmem:[%s2063_s17 + $0xfb0] sm:$0xff] %v1151_v46  ;;  %1664 = vst [vmem:[%s2063_s17 + $0xfb8] sm:$0xff] %v1152_v47  ;;  %v1157_v58 = vmul.f32 2.5, %v645_v55  ;;  %v1158_v59 = vmul.f32 2.5, %v646_v56  ;;  %v647_v60 = vld [vmem:[%s2048_s30 + $0xff0] sm:$0xff]  ;;  %v648_v61 = vld [vmem:[%s2048_s30 + $0xff8] sm:$0xff] }
 0x137   : > { %1665 = vst [vmem:[%s2063_s17 + $0xfc0] sm:$0xff] %v1153_v51  ;;  %1666 = vst [vmem:[%s2063_s17 + $0xfc8] sm:$0xff] %v1154_v52  ;;  %v1159_v62 = vmul.f32 2.5, %v647_v60  ;;  %v1160_v63 = vmul.f32 2.5, %v648_v61  ;;  %s1674_s3 = scalar_lea.sflag [#allocation4], %s2044_s23  ;;  %s1856_s4 = scalar_lea.vmem %s3085_s27, 65536 }
 0x138   : > { %1667 = vst [vmem:[%s2063_s17 + $0xfd0] sm:$0xff] %v1155_v53  ;;  %1668 = vst [vmem:[%s2063_s17 + $0xfd8] sm:$0xff] %v1156_v57  ;;  %p1857_p6 = scmp.ne.s32.totalorder %s3085_s27, %s1856_s4  ;;  %p3139_p11 = scmp.ne.s32.totalorder %s3136_s18, 0 }
 0x139   : > { %1669 = vst [vmem:[%s2063_s17 + $0xfe0] sm:$0xff] %v1157_v58  ;;  %1670 = vst [vmem:[%s2063_s17 + $0xfe8] sm:$0xff] %v1158_v59  ;;  %s1927_s10 = smov [#allocation5]  }
 0x13a   : > { %1671 = vst [vmem:[%s2063_s17 + $0xff0] sm:$0xff] %v1159_v62  ;;  %1672 = vst [vmem:[%s2063_s17 + $0xff8] sm:$0xff] %v1160_v63  ;;  %p1858_p12 = pnand %p1857_p6, %p3139_p11  ;;  %s1860_s5 = sshll.u32 %s1927_s10, 4  ;;  %s1861_s5 = int_to_ptr.vmem [resolvable:$false] %s1860_s5 }
 0x13b   : > { %s1862_s11 = scalar_lea.vmem %s1861_s5, 131072  ;;  %p1863_p8 = scmp.lt.s32.totalorder %s3085_s27, %s1861_s5 }
 0x13c   : > { %p1859_p13 = pneg %p1858_p12  ;;  %p1864_p10 = scmp.lt.s32.totalorder %s1862_s11, %s1856_s4 }
 0x13e   : > { %p1865_p0 = por %p1864_p10, %p1863_p8 }
 0x140   : > { %p1866_p2 = pnand %p1865_p0, %p1859_p13 }
 0x142   : > { %1869 = shalt.err (!%p1866_p2)
}
 0x143   : > { %s1870_s13 = scalar_lea.hbm %s3083_s2, 65536  ;;  %s1874_s20 = scalar_lea.hbm %s3132_s1, 131072 }
 0x144   : > { %p1871_p4 = scmp.ne.s32.totalorder %s3083_s2, %s1870_s13  ;;  %p1875_p9 = scmp.lt.u32.totalorder %s3083_s2, %s3132_s1 }
 0x145   : > { %p1876_p1 = scmp.lt.u32.totalorder %s1874_s20, %s1870_s13  ;;  %p1878_p6 = scmp.lt.u32.totalorder %s1870_s13, %s3083_s2 }
 0x146   : > { %p1872_p5 = pnand %p1871_p4, %p3139_p11 }
 0x147   : > { %p1877_p3 = por %p1876_p1, %p1875_p9 }
 0x148   : > { %p1873_p7 = pneg %p1872_p5 }
 0x149   : > { %p1879_p12 = por %p1878_p6, %p1877_p3 }
 0x14b   : > { %p1880_p13 = pnand %p1879_p12, %p1873_p7 }
 0x14d   : > { %1883 = shalt.err (!%p1880_p13)
}
 0x14e   : > { %s1928_s24 = smov 128   ;;  %s1929_s26 = smov 8  }
 0x14f   : > { %1778 = dma.vmem_to_hbm [thread:$0]  (%p3139_p11), %s3085_s27, 65536, %s3083_s2, %s1674_s3, %s1928_s24, %s1928_s24, %s1929_s26  }
 0x150 PF: > { %s1702_s30 = sand.u32 1, %s1910_s6   ;;  %p3140_p8 = scmp.ne.s32.totalorder %s3137_s19, 0 }
 0x151   : > { %p3141_p10 = scmp.ge.s32.totalorder %s1922_s9, 2  ;;  %s1703_s17 = scalar_lea.sflag [#allocation4], %s1702_s30 }
 0x153   : > { %p1785_p0 = pnand %p3141_p10, %p3140_p8 }
 0x155   : > { %1905 = dma.done.wait (!%p1785_p0), %s1703_s17, 65536  }
 0x156   : > { %1907 = vsyncadd (!%p1785_p0), %s1703_s17, 4294901760  ;;  %p14_p2 = scmp.ge.s32.totalorder %s1965_s12, 4   ;;  %s3142_s6 = smov %s1914_s7 }
 0x157   : > { %s3143_s7 = smov %s1918_s8  ;;  %s3144_s8 = smov %s1977_s15 }
 0x158   : > { %s3145_s9 = smov %s1965_s12  ;;  %16 = sbr.rel (!%p14_p2) target bundleno = 5 (0x5), region = 69 }
 0x15f   :  { %1708 = vsyncpa [#allocation3], 1 }
 0x160   :  { %1710 = vsyncpa [#allocation3 + $0x1], 1 }
 0x161   :  { %1711 = vsyncpa [#allocation4], 1 }
 0x162   :  { %1713 = vsyncpa [#allocation4 + $0x1], 1 }

</bundles_post_ra>
